<compile_context>
chip_gen: v5e
topology: v5e:2x2
jax: 0.10.0
libtpu: 0.0.40
codegen_flags: <defaults>
</compile_context>

<pallas_src>
import functools
import math

import jax
import jax.numpy as jnp
import numpy as np
from jax.experimental import pallas as pl
from jax.experimental.pallas import tpu as pltpu

NUM_OBS_VEH = 5
OBS_DIM = 7
IN_DIM = NUM_OBS_VEH * OBS_DIM          # 35
EMBED = 32
NUM_HEADS = 4
HEAD_DIM = EMBED // NUM_HEADS           # 8
H1 = 64

V = NUM_OBS_VEH
GROUPS = V * NUM_HEADS                  # 20 (query i, head h) pairs
TRUNK_W = V * EMBED                     # 160 trunk features (all vehicles)
QR_W = V * TRUNK_W                      # 800 = q replicated over the 5 keys
VPR_W = V * GROUPS                      # 100 = vp_j replicated over the 5 queries
OFF_Q = 0
OFF_K = 896                             # 800 rounded up to a multiple of 128
OFF_V = 1792                            # 896 + 896
PROJ_W = OFF_V + VPR_W                  # 1892
H2_W = TRUNK_W + 1                      # 161: trunk features + constant-1 column


def _round_up(a, b):
    return ((a + b - 1) // b) * b


def _critic_kernel(x_ref, w1_ref, b1_ref, w2_ref, b2_ref, wp_ref,
                   hsum_ref, rep_ref, asum_ref, bcomb_ref, o_ref):
    """One grid step processes TB samples.

    x_ref    : (TB, 35)      raw observations (5 vehicles x 7 features on lanes)
    w1/b1    : (35, 320)/(1,320)    block-diag Linear(7,64) over vehicles
    w2/b2    : (320, 161)/(1,161)   block-diag Linear(64,32); col 160 is a
                                    constant-1 passthrough (carries proj bias)
    wp       : (161, 1892)   fused attention projection -> [QR | KR | VPR]
    hsum     : (800, 100)    sums each head's 8 lanes of QR*KR into one score
    rep      : (20, 100)     replicates the per-(i,h) max back over the 5 keys
    asum     : (100, 20)     sums over the 5 keys (softmax num/den)
    bcomb    : (1, 1)        bo @ Wv^T + bv
    o_ref    : (1, 1, TB)    per-sample value, lane-dense
    """
    x = x_ref[...]                                            # (TB, 35)

    # ---- trunk: both Linear+ReLU layers fused across the 5 vehicles --------
    h = jnp.dot(x, w1_ref[...], preferred_element_type=jnp.float32) + b1_ref[...]
    h = jnp.maximum(h, 0.0)                                   # (TB, 320)
    h = jnp.dot(h, w2_ref[...], preferred_element_type=jnp.float32) + b2_ref[...]
    h = jnp.maximum(h, 0.0)                                   # (TB, 161); col 160 == 1

    # ---- fused attention in-projection (bias folded via the ones column) ---
    proj = jnp.dot(h, wp_ref[...], preferred_element_type=jnp.float32)  # (TB, 1892)
    qr = proj[:, OFF_Q:OFF_Q + QR_W]                          # (TB, 800) scaled q_i, layout (j,i,h,d)
    kr = proj[:, OFF_K:OFF_K + QR_W]                          # (TB, 800) k_j,        layout (j,i,h,d)
    vpr = proj[:, OFF_V:OFF_V + VPR_W]                        # (TB, 100) vp_j,       layout (j,i,h)

    # ---- all 25 attention score pairs at once -------------------------------
    #   s[:, j*20 + i*4 + h] = (q_i . k_j)_head_h / sqrt(head_dim)
    p = qr * kr                                               # (TB, 800)
    s = jnp.dot(p, hsum_ref[...], preferred_element_type=jnp.float32)   # (TB, 100)

    # ---- packed softmax over the key axis j ---------------------------------
    m = s[:, 0:GROUPS]                                        # per-(i,h) max over j
    for j in range(1, V):
        m = jnp.maximum(m, s[:, j * GROUPS:(j + 1) * GROUPS])
    m_rep = jnp.dot(m, rep_ref[...], preferred_element_type=jnp.float32)  # (TB, 100)

    e = jnp.exp(s - m_rep)                                    # (TB, 100)
    den = jnp.dot(e, asum_ref[...], preferred_element_type=jnp.float32)        # (TB, 20)
    num = jnp.dot(e * vpr, asum_ref[...], preferred_element_type=jnp.float32)  # (TB, 20)

    # EUP approximate reciprocal + 2 Newton steps -> f32-accurate, no VALU divide.
    r = pl.reciprocal(den, approx=True)
    r = r * (2.0 - den * r)
    r = r * (2.0 - den * r)
    attn = num * r                                            # (TB, 20): sum_j w_ij * vp_jh

    # value[b] = (1/5) * sum_{i,h} attn[b, i, h] + bcomb, emitted lane-dense (1, TB).
    coef = jnp.full((1, GROUPS), 1.0 / V, jnp.float32)
    val_t = jax.lax.dot_general(coef, attn, (((1,), (1,)), ((), ())),
                                preferred_element_type=jnp.float32)      # (1, TB)
    o_ref[0] = val_t + bcomb_ref[...]


@functools.partial(jax.jit, static_argnames=("block_b",))
def critic_forward(x, params, block_b=512):
    B = x.shape[0]
    if x.ndim != 2 or x.shape[1] != IN_DIM:
        x = x.reshape(B, IN_DIM)
    if x.dtype != jnp.float32:
        x = x.astype(jnp.float32)

    # Batch tile: multiple of 8 sublanes, default 512 (clamped for tiny batches).
    tb = min(block_b, _round_up(B, 8))
    tb = max(8, (tb // 8) * 8)
    b_pad = _round_up(B, tb)
    num_tiles = b_pad // tb
    if b_pad != B:
        x = jnp.pad(x, ((0, b_pad - B), (0, 0)))

    f32 = jnp.float32
    scale = 1.0 / math.sqrt(HEAD_DIM)
    eye_v = jnp.eye(V, dtype=f32)

    # ---- trunk: block-diagonal over the 5 vehicles --------------------------
    w1blk = jnp.kron(eye_v, params["w1"].T.astype(f32))               # (35, 320)
    b1blk = jnp.tile(params["b1"].astype(f32), V).reshape(1, -1)       # (1, 320)
    w2blk = jnp.kron(eye_v, params["w2"].T.astype(f32))               # (320, 160)
    # Constant-1 output column (zero weights, bias 1, ReLU(1)=1): it carries the
    # fused-projection bias so the kernel needs no (TB, 1892) bias add.
    w2blk = jnp.concatenate([w2blk, jnp.zeros((V * H1, 1), f32)], axis=1)   # (320, 161)
    b2blk = jnp.concatenate([jnp.tile(params["b2"].astype(f32), V),
                             jnp.ones((1,), f32)]).reshape(1, -1)           # (1, 161)

    # ---- attention in-projection pieces --------------------------------------
    wq_t = params["wqkv"][:EMBED].T.astype(f32)                        # (32, 32)
    wk_t = params["wqkv"][EMBED:2 * EMBED].T.astype(f32)
    wv_t = params["wqkv"][2 * EMBED:].T.astype(f32)
    bq = params["bqkv"][:EMBED].astype(f32)
    bk = params["bqkv"][EMBED:2 * EMBED].astype(f32)
    bv_in = params["bqkv"][2 * EMBED:].astype(f32)

    # Fold out_proj -> mean -> value_head into one length-32 vector + scalar.
    wcomb = (params["wv"].astype(f32) @ params["wo"].astype(f32)).reshape(EMBED)
    bcomb = (params["bo"].astype(f32) @ params["wv"].astype(f32).T
             + params["bv"].astype(f32)).reshape(1, 1)

    # Per-head lane-sum (32 -> 4) and the folded value projection (32 -> 4).
    hsum_head = jnp.kron(jnp.eye(NUM_HEADS, dtype=f32), jnp.ones((HEAD_DIM, 1), f32))
    wvp = (wv_t * wcomb[None, :]) @ hsum_head                          # (32, 4)
    bvp = (bv_in * wcomb) @ hsum_head                                  # (4,)

    # QR: q_i (pre-scaled), block-diag over i, tiled over the key index j (outer).
    wqr = jnp.tile(jnp.kron(eye_v, wq_t) * scale, (1, V))              # (160, 800)
    bqr = jnp.tile(jnp.tile(bq, V) * scale, V)                         # (800,)
    # KR: k_j, block-diag over j (outer), replicated over the query index i (inner).
    wkr = jnp.kron(eye_v, jnp.tile(wk_t, (1, V)))                      # (160, 800)
    bkr = jnp.tile(bk, V * V)                                          # (800,)
    # VPR: vp_j (value folded through wcomb & head-sum), replicated over i.
    wvpr = jnp.kron(eye_v, jnp.tile(wvp, (1, V)))                      # (160, 100)
    bvpr = jnp.tile(bvp, V * V)                                        # (100,)

    wp = jnp.zeros((H2_W, PROJ_W), f32)
    wp = wp.at[:TRUNK_W, OFF_Q:OFF_Q + QR_W].set(wqr)
    wp = wp.at[:TRUNK_W, OFF_K:OFF_K + QR_W].set(wkr)
    wp = wp.at[:TRUNK_W, OFF_V:OFF_V + VPR_W].set(wvpr)
    # Bias row rides on the constant-1 trunk column (row index 160).
    wp = wp.at[TRUNK_W, OFF_Q:OFF_Q + QR_W].set(bqr)
    wp = wp.at[TRUNK_W, OFF_K:OFF_K + QR_W].set(bkr)
    wp = wp.at[TRUNK_W, OFF_V:OFF_V + VPR_W].set(bvpr)

    # (800, 100): sums each head's 8 lanes of QR*KR into one score lane.
    hsum8 = jnp.kron(jnp.eye(V * GROUPS, dtype=f32), jnp.ones((HEAD_DIM, 1), f32))
    # (20, 100): replicate the per-(i,h) max back over the 5 keys.
    rep = jnp.tile(jnp.eye(GROUPS, dtype=f32), (1, V))
    # (100, 20): sum over the 5 keys.
    asum = jnp.tile(jnp.eye(GROUPS, dtype=f32), (V, 1))

    def const_spec(a):
        nd = a.ndim
        # Full-array block, constant index: fetched into VMEM once and kept
        # resident (block index never changes across the grid).
        return pl.BlockSpec(a.shape, lambda t, _nd=nd: (0,) * _nd)

    out = pl.pallas_call(
        _critic_kernel,
        out_shape=jax.ShapeDtypeStruct((num_tiles, 1, tb), f32),
        grid=(num_tiles,),
        in_specs=[
            pl.BlockSpec((tb, IN_DIM), lambda t: (t, 0)),
            const_spec(w1blk), const_spec(b1blk),
            const_spec(w2blk), const_spec(b2blk),
            const_spec(wp),
            const_spec(hsum8), const_spec(rep), const_spec(asum),
            const_spec(bcomb),
        ],
        out_specs=pl.BlockSpec((1, 1, tb), lambda t: (t, 0, 0)),
        compiler_params=pltpu.CompilerParams(
            dimension_semantics=("parallel",),          # megacore on v7x
            vmem_limit_bytes=64 * 1024 * 1024),
    )(x, w1blk, b1blk, w2blk, b2blk, wp, hsum8, rep, asum, bcomb)

    return out.reshape(-1)[:B].reshape(B, 1)


def init_params(key):
    """Deterministic PyTorch-Linear-style (uniform +-1/sqrt(fan_in)) init."""
    ks = jax.random.split(key, 5)

    def lin(k, out_dim, in_dim):
        bound = 1.0 / math.sqrt(in_dim)
        kw, kb = jax.random.split(k)
        w = jax.random.uniform(kw, (out_dim, in_dim), jnp.float32, -bound, bound)
        b = jax.random.uniform(kb, (out_dim,), jnp.float32, -bound, bound)
        return w, b

    w1, b1 = lin(ks[0], H1, OBS_DIM)
    w2, b2 = lin(ks[1], EMBED, H1)
    wqkv, bqkv = lin(ks[2], 3 * EMBED, EMBED)
    wo, bo = lin(ks[3], EMBED, EMBED)
    wv, bv = lin(ks[4], 1, EMBED)
    return dict(w1=w1, b1=b1, w2=w2, b2=b2, wqkv=wqkv, bqkv=bqkv,
                wo=wo, bo=bo, wv=wv, bv=bv)


def critic_reference(x, p):
    """Pure-JAX replica of the PyTorch forward (for validation)."""
    B = x.shape[0]
    xr = x.reshape(B, NUM_OBS_VEH, OBS_DIM)
    h = jax.nn.relu(xr @ p["w1"].T + p["b1"])
    h = jax.nn.relu(h @ p["w2"].T + p["b2"])
    qkv = h @ p["wqkv"].T + p["bqkv"]
    q, k, v = jnp.split(qkv, 3, axis=-1)

    def split_heads(t):
        return t.reshape(B, NUM_OBS_VEH, NUM_HEADS, HEAD_DIM).transpose(0, 2, 1, 3)

    qh, kh, vh = map(split_heads, (q, k, v))
    scores = (qh / math.sqrt(HEAD_DIM)) @ kh.transpose(0, 1, 3, 2)
    attn = jax.nn.softmax(scores, axis=-1) @ vh
    attn = attn.transpose(0, 2, 1, 3).reshape(B, NUM_OBS_VEH, EMBED)
    ao = attn @ p["wo"].T + p["bo"]
    pooled = ao.mean(axis=1)
    return pooled @ p["wv"].T + p["bv"]


if __name__ == "__main__":
    key = jax.random.PRNGKey(0)
    k_param, k_x, k_x2 = jax.random.split(key, 3)
    params = init_params(k_param)

    # Small demo batch (single tile, padded to 8 rows).
    B = 2
    x = jax.random.normal(k_x, (B, NUM_OBS_VEH * OBS_DIM), jnp.float32)
    out = jax.block_until_ready(critic_forward(x, params))
    ref = critic_reference(x, params)
    np.testing.assert_allclose(np.asarray(out), np.asarray(ref),
                               rtol=1e-4, atol=1e-4)

    # Ragged, multi-tile case (3 tiles of 16 rows, 11 rows of padding dropped).
    B2 = 37
    x2 = jax.random.normal(k_x2, (B2, NUM_OBS_VEH * OBS_DIM), jnp.float32)
    out2 = jax.block_until_ready(critic_forward(x2, params, block_b=16))
    ref2 = critic_reference(x2, params)
    np.testing.assert_allclose(np.asarray(out2), np.asarray(ref2),
                               rtol=1e-4, atol=1e-4)

    print("KERNEL_OK")
</pallas_src>

<mosaic_0001>
module attributes {stable_mosaic.version = 11 : i64} {
  func.func @_critic_kernel(%arg0: i32, %arg1: memref<8x35xf32, #tpu.memory_space<vmem>>, %arg2: memref<35x320xf32, #tpu.memory_space<vmem>>, %arg3: memref<1x320xf32, #tpu.memory_space<vmem>>, %arg4: memref<320x161xf32, #tpu.memory_space<vmem>>, %arg5: memref<1x161xf32, #tpu.memory_space<vmem>>, %arg6: memref<161x1892xf32, #tpu.memory_space<vmem>>, %arg7: memref<800x100xf32, #tpu.memory_space<vmem>>, %arg8: memref<20x100xf32, #tpu.memory_space<vmem>>, %arg9: memref<100x20xf32, #tpu.memory_space<vmem>>, %arg10: memref<1x1xf32, #tpu.memory_space<vmem>>, %arg11: memref<1x1x8xf32, #tpu.memory_space<vmem>>) attributes {dimension_semantics = [#tpu.dimension_semantics<parallel>], iteration_bounds = array<i64: 1>, scalar_prefetch = 0 : i64, scratch_operands = 0 : i64, tpu.core_type = #tpu.core_type<tc>, window_params = [{transform_indices = @transform_0, window_bounds = array<i64: 8, 35>}, {pipeline_mode = #tpu.pipeline_mode<synchronous>, transform_indices = @transform_1, window_bounds = array<i64: 35, 320>}, {pipeline_mode = #tpu.pipeline_mode<synchronous>, transform_indices = @transform_2, window_bounds = array<i64: 1, 320>}, {pipeline_mode = #tpu.pipeline_mode<synchronous>, transform_indices = @transform_3, window_bounds = array<i64: 320, 161>}, {pipeline_mode = #tpu.pipeline_mode<synchronous>, transform_indices = @transform_4, window_bounds = array<i64: 1, 161>}, {pipeline_mode = #tpu.pipeline_mode<synchronous>, transform_indices = @transform_5, window_bounds = array<i64: 161, 1892>}, {pipeline_mode = #tpu.pipeline_mode<synchronous>, transform_indices = @transform_6, window_bounds = array<i64: 800, 100>}, {pipeline_mode = #tpu.pipeline_mode<synchronous>, transform_indices = @transform_7, window_bounds = array<i64: 20, 100>}, {pipeline_mode = #tpu.pipeline_mode<synchronous>, transform_indices = @transform_8, window_bounds = array<i64: 100, 20>}, {pipeline_mode = #tpu.pipeline_mode<synchronous>, transform_indices = @transform_9, window_bounds = array<i64: 1, 1>}, {transform_indices = @transform_10, window_bounds = array<i64: 1, 1, 8>}]} {
    %c0 = arith.constant 0 : index
    %c0_0 = arith.constant 0 : index
    %0 = vector.load %arg1[%c0, %c0_0] : memref<8x35xf32, #tpu.memory_space<vmem>>, vector<8x35xf32>
    %c0_1 = arith.constant 0 : index
    %c0_2 = arith.constant 0 : index
    %1 = vector.load %arg2[%c0_1, %c0_2] : memref<35x320xf32, #tpu.memory_space<vmem>>, vector<35x320xf32>
    %cst = arith.constant dense<0.000000e+00> : vector<8x320xf32>
    %2 = tpu.matmul %0, %1, %cst {dimension_numbers = #tpu.dot_dimension_numbers<[1], [0], [0], [1], [0, 0, 1, 1], [], []>} : vector<8x35xf32>, vector<35x320xf32>, vector<8x320xf32> -> vector<8x320xf32>
    %c0_3 = arith.constant 0 : index
    %c0_4 = arith.constant 0 : index
    %3 = vector.load %arg3[%c0_3, %c0_4] : memref<1x320xf32, #tpu.memory_space<vmem>>, vector<1x320xf32>
    %4 = vector.broadcast %3 : vector<1x320xf32> to vector<8x320xf32>
    %5 = arith.addf %2, %4 : vector<8x320xf32>
    %cst_5 = arith.constant 0.000000e+00 : f32
    %6 = vector.broadcast %cst_5 : f32 to vector<8x320xf32>
    %7 = arith.maximumf %5, %6 : vector<8x320xf32>
    %c0_6 = arith.constant 0 : index
    %c0_7 = arith.constant 0 : index
    %8 = vector.load %arg4[%c0_6, %c0_7] : memref<320x161xf32, #tpu.memory_space<vmem>>, vector<320x161xf32>
    %cst_8 = arith.constant dense<0.000000e+00> : vector<8x161xf32>
    %9 = tpu.matmul %7, %8, %cst_8 {dimension_numbers = #tpu.dot_dimension_numbers<[1], [0], [0], [1], [0, 0, 1, 1], [], []>} : vector<8x320xf32>, vector<320x161xf32>, vector<8x161xf32> -> vector<8x161xf32>
    %c0_9 = arith.constant 0 : index
    %c0_10 = arith.constant 0 : index
    %10 = vector.load %arg5[%c0_9, %c0_10] : memref<1x161xf32, #tpu.memory_space<vmem>>, vector<1x161xf32>
    %11 = vector.broadcast %10 : vector<1x161xf32> to vector<8x161xf32>
    %12 = arith.addf %9, %11 : vector<8x161xf32>
    %cst_11 = arith.constant 0.000000e+00 : f32
    %13 = vector.broadcast %cst_11 : f32 to vector<8x161xf32>
    %14 = arith.maximumf %12, %13 : vector<8x161xf32>
    %c0_12 = arith.constant 0 : index
    %c0_13 = arith.constant 0 : index
    %15 = vector.load %arg6[%c0_12, %c0_13] : memref<161x1892xf32, #tpu.memory_space<vmem>>, vector<161x1892xf32>
    %cst_14 = arith.constant dense<0.000000e+00> : vector<8x1892xf32>
    %16 = tpu.matmul %14, %15, %cst_14 {dimension_numbers = #tpu.dot_dimension_numbers<[1], [0], [0], [1], [0, 0, 1, 1], [], []>} : vector<8x161xf32>, vector<161x1892xf32>, vector<8x1892xf32> -> vector<8x1892xf32>
    %17 = vector.extract_strided_slice %16 {offsets = [0, 0], sizes = [8, 800], strides = [1, 1]} : vector<8x1892xf32> to vector<8x800xf32>
    %18 = vector.extract_strided_slice %16 {offsets = [0, 896], sizes = [8, 800], strides = [1, 1]} : vector<8x1892xf32> to vector<8x800xf32>
    %19 = vector.extract_strided_slice %16 {offsets = [0, 1792], sizes = [8, 100], strides = [1, 1]} : vector<8x1892xf32> to vector<8x100xf32>
    %20 = arith.mulf %17, %18 : vector<8x800xf32>
    %c0_15 = arith.constant 0 : index
    %c0_16 = arith.constant 0 : index
    %21 = vector.load %arg7[%c0_15, %c0_16] : memref<800x100xf32, #tpu.memory_space<vmem>>, vector<800x100xf32>
    %cst_17 = arith.constant dense<0.000000e+00> : vector<8x100xf32>
    %22 = tpu.matmul %20, %21, %cst_17 {dimension_numbers = #tpu.dot_dimension_numbers<[1], [0], [0], [1], [0, 0, 1, 1], [], []>} : vector<8x800xf32>, vector<800x100xf32>, vector<8x100xf32> -> vector<8x100xf32>
    %23 = vector.extract_strided_slice %22 {offsets = [0, 0], sizes = [8, 20], strides = [1, 1]} : vector<8x100xf32> to vector<8x20xf32>
    %24 = vector.extract_strided_slice %22 {offsets = [0, 20], sizes = [8, 20], strides = [1, 1]} : vector<8x100xf32> to vector<8x20xf32>
    %25 = arith.maximumf %23, %24 : vector<8x20xf32>
    %26 = vector.extract_strided_slice %22 {offsets = [0, 40], sizes = [8, 20], strides = [1, 1]} : vector<8x100xf32> to vector<8x20xf32>
    %27 = arith.maximumf %25, %26 : vector<8x20xf32>
    %28 = vector.extract_strided_slice %22 {offsets = [0, 60], sizes = [8, 20], strides = [1, 1]} : vector<8x100xf32> to vector<8x20xf32>
    %29 = arith.maximumf %27, %28 : vector<8x20xf32>
    %30 = vector.extract_strided_slice %22 {offsets = [0, 80], sizes = [8, 20], strides = [1, 1]} : vector<8x100xf32> to vector<8x20xf32>
    %31 = arith.maximumf %29, %30 : vector<8x20xf32>
    %c0_18 = arith.constant 0 : index
    %c0_19 = arith.constant 0 : index
    %32 = vector.load %arg8[%c0_18, %c0_19] : memref<20x100xf32, #tpu.memory_space<vmem>>, vector<20x100xf32>
    %cst_20 = arith.constant dense<0.000000e+00> : vector<8x100xf32>
    %33 = tpu.matmul %31, %32, %cst_20 {dimension_numbers = #tpu.dot_dimension_numbers<[1], [0], [0], [1], [0, 0, 1, 1], [], []>} : vector<8x20xf32>, vector<20x100xf32>, vector<8x100xf32> -> vector<8x100xf32>
    %34 = arith.subf %22, %33 : vector<8x100xf32>
    %35 = math.exp %34 : vector<8x100xf32>
    %c0_21 = arith.constant 0 : index
    %c0_22 = arith.constant 0 : index
    %36 = vector.load %arg9[%c0_21, %c0_22] : memref<100x20xf32, #tpu.memory_space<vmem>>, vector<100x20xf32>
    %cst_23 = arith.constant dense<0.000000e+00> : vector<8x20xf32>
    %37 = tpu.matmul %35, %36, %cst_23 {dimension_numbers = #tpu.dot_dimension_numbers<[1], [0], [0], [1], [0, 0, 1, 1], [], []>} : vector<8x100xf32>, vector<100x20xf32>, vector<8x20xf32> -> vector<8x20xf32>
    %38 = arith.mulf %35, %19 : vector<8x100xf32>
    %c0_24 = arith.constant 0 : index
    %c0_25 = arith.constant 0 : index
    %39 = vector.load %arg9[%c0_24, %c0_25] : memref<100x20xf32, #tpu.memory_space<vmem>>, vector<100x20xf32>
    %cst_26 = arith.constant dense<0.000000e+00> : vector<8x20xf32>
    %40 = tpu.matmul %38, %39, %cst_26 {dimension_numbers = #tpu.dot_dimension_numbers<[1], [0], [0], [1], [0, 0, 1, 1], [], []>} : vector<8x100xf32>, vector<100x20xf32>, vector<8x20xf32> -> vector<8x20xf32>
    %41 = tpu.reciprocal %37 {approx = true} : vector<8x20xf32> -> vector<8x20xf32>
    %42 = arith.mulf %37, %41 : vector<8x20xf32>
    %cst_27 = arith.constant 2.000000e+00 : f32
    %43 = vector.broadcast %cst_27 : f32 to vector<8x20xf32>
    %44 = arith.subf %43, %42 : vector<8x20xf32>
    %45 = arith.mulf %41, %44 : vector<8x20xf32>
    %46 = arith.mulf %37, %45 : vector<8x20xf32>
    %cst_28 = arith.constant 2.000000e+00 : f32
    %47 = vector.broadcast %cst_28 : f32 to vector<8x20xf32>
    %48 = arith.subf %47, %46 : vector<8x20xf32>
    %49 = arith.mulf %45, %48 : vector<8x20xf32>
    %50 = arith.mulf %40, %49 : vector<8x20xf32>
    %cst_29 = arith.constant 2.000000e-01 : f32
    %51 = vector.broadcast %cst_29 : f32 to vector<1x20xf32>
    %cst_30 = arith.constant dense<0.000000e+00> : vector<1x8xf32>
    %52 = tpu.matmul %51, %50, %cst_30 {dimension_numbers = #tpu.dot_dimension_numbers<[1], [1], [0], [0], [0, 0, 1, 0], [], []>} : vector<1x20xf32>, vector<8x20xf32>, vector<1x8xf32> -> vector<1x8xf32>
    %c0_31 = arith.constant 0 : index
    %c0_32 = arith.constant 0 : index
    %53 = vector.load %arg10[%c0_31, %c0_32] : memref<1x1xf32, #tpu.memory_space<vmem>>, vector<1x1xf32>
    %54 = vector.broadcast %53 : vector<1x1xf32> to vector<1x8xf32>
    %55 = arith.addf %52, %54 : vector<1x8xf32>
    %c0_33 = arith.constant 0 : index
    %c0_34 = arith.constant 0 : index
    %c0_35 = arith.constant 0 : index
    %56 = vector.load %arg11[%c0_33, %c0_34, %c0_35] : memref<1x1x8xf32, #tpu.memory_space<vmem>>, vector<1x1x8xf32>
    %57 = vector.shape_cast %56 : vector<1x1x8xf32> to vector<1x8xf32>
    %58 = vector.shape_cast %55 : vector<1x8xf32> to vector<1x1x8xf32>
    tpu.vector_store %arg11[%c0_33, %c0_34, %c0_35], %58 {strides = array<i32>} : memref<1x1x8xf32, #tpu.memory_space<vmem>>, vector<1x1x8xf32>,
    return
  }
  func.func @transform_0(%arg0: i32) -> (i32, i32) {
    %c0_i32 = arith.constant 0 : i32
    %c0_i32_0 = arith.constant 0 : i32
    return %arg0, %c0_i32 : i32, i32
  }
  func.func @transform_1(%arg0: i32) -> (i32, i32) {
    %c0_i32 = arith.constant 0 : i32
    %c0_i32_0 = arith.constant 0 : i32
    %c0_i32_1 = arith.constant 0 : i32
    return %c0_i32, %c0_i32_0 : i32, i32
  }
  func.func @transform_2(%arg0: i32) -> (i32, i32) {
    %c0_i32 = arith.constant 0 : i32
    %c0_i32_0 = arith.constant 0 : i32
    %c0_i32_1 = arith.constant 0 : i32
    return %c0_i32, %c0_i32_0 : i32, i32
  }
  func.func @transform_3(%arg0: i32) -> (i32, i32) {
    %c0_i32 = arith.constant 0 : i32
    %c0_i32_0 = arith.constant 0 : i32
    %c0_i32_1 = arith.constant 0 : i32
    return %c0_i32, %c0_i32_0 : i32, i32
  }
  func.func @transform_4(%arg0: i32) -> (i32, i32) {
    %c0_i32 = arith.constant 0 : i32
    %c0_i32_0 = arith.constant 0 : i32
    %c0_i32_1 = arith.constant 0 : i32
    return %c0_i32, %c0_i32_0 : i32, i32
  }
  func.func @transform_5(%arg0: i32) -> (i32, i32) {
    %c0_i32 = arith.constant 0 : i32
    %c0_i32_0 = arith.constant 0 : i32
    %c0_i32_1 = arith.constant 0 : i32
    return %c0_i32, %c0_i32_0 : i32, i32
  }
  func.func @transform_6(%arg0: i32) -> (i32, i32) {
    %c0_i32 = arith.constant 0 : i32
    %c0_i32_0 = arith.constant 0 : i32
    %c0_i32_1 = arith.constant 0 : i32
    return %c0_i32, %c0_i32_0 : i32, i32
  }
  func.func @transform_7(%arg0: i32) -> (i32, i32) {
    %c0_i32 = arith.constant 0 : i32
    %c0_i32_0 = arith.constant 0 : i32
    %c0_i32_1 = arith.constant 0 : i32
    return %c0_i32, %c0_i32_0 : i32, i32
  }
  func.func @transform_8(%arg0: i32) -> (i32, i32) {
    %c0_i32 = arith.constant 0 : i32
    %c0_i32_0 = arith.constant 0 : i32
    %c0_i32_1 = arith.constant 0 : i32
    return %c0_i32, %c0_i32_0 : i32, i32
  }
  func.func @transform_9(%arg0: i32) -> (i32, i32) {
    %c0_i32 = arith.constant 0 : i32
    %c0_i32_0 = arith.constant 0 : i32
    %c0_i32_1 = arith.constant 0 : i32
    return %c0_i32, %c0_i32_0 : i32, i32
  }
  func.func @transform_10(%arg0: i32) -> (i32, i32, i32) {
    %c0_i32 = arith.constant 0 : i32
    %c0_i32_0 = arith.constant 0 : i32
    %c0_i32_1 = arith.constant 0 : i32
    return %arg0, %c0_i32, %c0_i32_0 : i32, i32, i32
  }
}

</mosaic_0001>

<bundles_post_ra>
// kernel: tile.78
= control target key start
LH: loop header
LB: loop body
LE: loop exit
PB: predicated region body
PF: predicated region fallthrough
CT: control target
= control target key end

     0   :  { %s34_s0 = inlined_call_operand.vmem [shape: f32[160], index: 0, kind: input, shape index: {}]   ;;  %s35_s1 = inlined_call_operand.vmem [shape: f32[5,160], index: 1, kind: output, shape index: {}]  }
   0x1   :  { %v4_v0 = vld [vmem:[%s34_s0] ss:$0 sm:$0xff]  ;;  %v10_v1 = vld [vmem:[%s34_s0 + $0x1] ss:$0 sm:$0xff] }
   0x2   :  { %5 = vst [vmem:[%s35_s1] sm:$0xff] %v4_v0 }
   0x3   :  { %11 = vst [vmem:[%s35_s1 + $0x8] sm:$0xff] %v10_v1 }

// kernel: tile.88
= control target key start
LH: loop header
LB: loop body
LE: loop exit
PB: predicated region body
PF: predicated region fallthrough
CT: control target
= control target key end

     0   :  { %s40_s0 = inlined_call_operand.vmem [shape: f32[32], index: 0, kind: input, shape index: {}]   ;;  %s41_s1 = inlined_call_operand.vmem [shape: f32[25,32], index: 1, kind: output, shape index: {}]  }
   0x1   :  { %v4_v0 = vld [vmem:[%s40_s0] ss:$0 sm:$0xff] }
   0x2   :  { %5 = vst [vmem:[%s41_s1] sm:$0xff] %v4_v0 }
   0x3   :  { %12 = vst [vmem:[%s41_s1 + $0x8] sm:$0xff] %v4_v0 }
   0x4   :  { %13 = vst [vmem:[%s41_s1 + $0x10] sm:$0xff] %v4_v0 }
   0x5   :  { %14 = vst [vmem:[%s41_s1 + $0x18] sm:$0xff] %v4_v0 }

// kernel: tile.98
= control target key start
LH: loop header
LB: loop body
LE: loop exit
PB: predicated region body
PF: predicated region fallthrough
CT: control target
= control target key end

     0   :  { %s40_s0 = inlined_call_operand.vmem [shape: f32[4], index: 0, kind: input, shape index: {}]   ;;  %s41_s1 = inlined_call_operand.vmem [shape: f32[25,4], index: 1, kind: output, shape index: {}]  }
   0x1   :  { %v4_v0 = vld [vmem:[%s40_s0] ss:$0 sm:$0xff] }
   0x2   :  { %5 = vst [vmem:[%s41_s1] sm:$0xff] %v4_v0 }
   0x3   :  { %12 = vst [vmem:[%s41_s1 + $0x8] sm:$0xff] %v4_v0 }
   0x4   :  { %13 = vst [vmem:[%s41_s1 + $0x10] sm:$0xff] %v4_v0 }
   0x5   :  { %14 = vst [vmem:[%s41_s1 + $0x18] sm:$0xff] %v4_v0 }

// kernel: tile.109
= control target key start
LH: loop header
LB: loop body
LE: loop exit
PB: predicated region body
PF: predicated region fallthrough
CT: control target
= control target key end

     0   :  { %vm4_vm0 = vcmask 1047556   ;;  %s171_s10 = smov 80   ;;  %s172_s25 = smov 60   ;;  %vm6_vm1 = vcmask 162816   ;;  %vm30_vm2 = vcmask 818816   ;;  %vm58_vm3 = vcmask 654816   ;;  %s324_s0 = inlined_call_operand.vmem [shape: f32[5,20,20], index: 0, kind: input, shape index: {}]   ;;  %s325_s1 = inlined_call_operand.vmem [shape: f32[100,20], index: 1, kind: output, shape index: {}]  }
   0x1   :  { %v144_v0 = vld [vmem:[%s324_s0 + $0x84] ss:$8 sm:$0xf]   ;;  %v146_v4 = vld [vmem:[%s324_s0 + $0x3] ss:$8 sm:$0xf]  }
   0x2   :  { %v139_v1 = vld [vmem:[%s324_s0 + $0x4] ss:$8 sm:$0xf]   ;;  %45 = vrot.lane.b32.xlu1 %v144_v0, %s171_s10  ;;  %v147_v5 = vld [vmem:[%s324_s0 + $0x3] ss:$8 sm:$0xf0]  }
   0x3   :  { %v140_v2 = vld [vmem:[%s324_s0 + $0x4] ss:$8 sm:$0xf0]   ;;  %v55_v8 = vsel %vm4_vm0, %v147_v5, %v146_v4  ;;  %v148_v9 = vld [vmem:[%s324_s0 + $0x43] ss:$8 sm:$0xf]  }
   0x4   :  { %v27_v3 = vsel %vm4_vm0, %v140_v2, %v139_v1  ;;  %v141_v6 = vld [vmem:[%s324_s0 + $0x44] ss:$8 sm:$0xf]   ;;  %v149_v10 = vld [vmem:[%s324_s0 + $0x43] ss:$8 sm:$0xf0]  }
   0x5   :  { %28 = vrot.lane.b32.xlu0 %v27_v3, %s171_s10  ;;  %v142_v7 = vld [vmem:[%s324_s0 + $0x44] ss:$8 sm:$0xf0]   ;;  %v65_v11 = vsel %vm4_vm0, %v149_v10, %v148_v9  ;;  %v155_v13 = vld [vmem:[%s324_s0 + $0x42] ss:$8 sm:$0xf]  }
   0x6   :  { %v37_v12 = vsel %vm4_vm0, %v142_v7, %v141_v6  ;;  %66 = vrot.lane.b32.xlu2 %v65_v11, %s172_s25  ;;  %v156_v14 = vld [vmem:[%s324_s0 + $0x42] ss:$8 sm:$0xf0]   ;;  %v151_v17 = vld [vmem:[%s324_s0 + $0x83] ss:$8 sm:$0xf]  }
   0x7   :  { %v153_v15 = vld [vmem:[%s324_s0 + $0x2] ss:$8 sm:$0xf]   ;;  %v93_v18 = vsel %vm4_vm0, %v156_v14, %v155_v13  ;;  %s173_s7 = smov 40   ;;  %s174_s18 = smov 20   ;;  %vm86_vm4 = vcmask 490816  }
   0x8   :  { %v154_v16 = vld [vmem:[%s324_s0 + $0x2] ss:$8 sm:$0xf0]   ;;  %v162_v20 = vld [vmem:[%s324_s0 + $0x41] ss:$8 sm:$0xf]  }
   0x9   :  { %v83_v19 = vsel %vm4_vm0, %v154_v16, %v153_v15  ;;  %v163_v21 = vld [vmem:[%s324_s0 + $0x41] ss:$8 sm:$0xf0]   ;;  %v158_v24 = vld [vmem:[%s324_s0 + $0x82] ss:$8 sm:$0xf]  }
   0xa   :  { %56 = vrot.lane.b32.xlu1 %v55_v8, %s172_s25  ;;  %v160_v22 = vld [vmem:[%s324_s0 + $0x1] ss:$8 sm:$0xf]   ;;  %v121_v25 = vsel %vm4_vm0, %v163_v21, %v162_v20  ;;  %v137_v28 = vld [vmem:[%s324_s0 + $0x80] ss:$8 sm:$0xf]  }
   0xb   :  { %v161_v23 = vld [vmem:[%s324_s0 + $0x1] ss:$8 sm:$0xf0]   ;;  %v2_v29 = vld [vmem:[%s324_s0] ss:$8 sm:$0xf]  }
   0xc   :  { %v111_v26 = vsel %vm4_vm0, %v161_v23, %v160_v22  ;;  %v165_v27 = vld [vmem:[%s324_s0 + $0x81] ss:$8 sm:$0xf]   ;;  %138 = vst.msk [vmem:[%s325_s1 + $0x10] sm:$0xf] %vm6_vm1, %v137_v28   ;;  %vm114_vm5 = vcmask 326816  }
   0xd   :  { %38 = vrot.lane.b32.xlu0 %v37_v12, %s171_s10  ;;  %v3_v30 = vld [vmem:[%s324_s0] ss:$8 sm:$0xf0]  }
   0xe   :  { %73 = vrot.lane.b32.xlu2 %v151_v17, %s172_s25  ;;  %v5_v31 = vsel %vm4_vm0, %v3_v30, %v2_v29  ;;  %v134_v32 = vld [vmem:[%s324_s0 + $0x40] ss:$8 sm:$0xf]  }
   0xf   :  { %7 = vst.msk [vmem:[%s325_s1] sm:$0xff] %vm6_vm1, %v5_v31   ;;  %v135_v33 = vld [vmem:[%s324_s0 + $0x40] ss:$8 sm:$0xf0]  }
  0x10   :  { %v13_v34 = vsel %vm4_vm0, %v135_v33, %v134_v32 }
  0x11   :  { %136 = vst.msk [vmem:[%s325_s1 + $0x8] sm:$0xff] %vm6_vm1, %v13_v34  }
  0x12   :  { %94 = vrot.lane.b32.xlu1 %v93_v18, %s173_s7 }
  0x15   :  { %84 = vrot.lane.b32.xlu0 %v83_v19, %s173_s7 }
  0x16   :  { %101 = vrot.lane.b32.xlu2 %v158_v24, %s173_s7 }
  0x1a   :  { %122 = vrot.lane.b32.xlu1 %v121_v25, %s174_s18 }
  0x1d   :  { %112 = vrot.lane.b32.xlu0 %v111_v26, %s174_s18 }
  0x1e   :  { %129 = vrot.lane.b32.xlu2 %v165_v27, %s174_s18 }
  0x60   :  { %v67_v35 = vpop.permute.xlu2 %66  }
  0x68   :  { %v74_v36 = vpop.permute.xlu2 %73  }
  0x70   :  { %v102_v37 = vpop.permute.xlu2 %101  }
  0x74   :  { %v46_v38 = vpop.permute.xlu1 %45  }
  0x75   :  { %145 = vst.msk [vmem:[%s325_s1 + $0x10] sm:$0xf] %vm30_vm2, %v46_v38  }
  0x76   :  { %152 = vst.msk [vmem:[%s325_s1 + $0x10] sm:$0xf] %vm58_vm3, %v74_v36  }
  0x77   :  { %v29_v39 = vpop.permute.xlu0 %28   ;;  %159 = vst.msk [vmem:[%s325_s1 + $0x10] sm:$0xf] %vm86_vm4, %v102_v37  }
  0x78   :  { %31 = vst.msk [vmem:[%s325_s1] sm:$0xff] %vm30_vm2, %v29_v39   ;;  %v130_v40 = vpop.permute.xlu2 %129  }
  0x79   :  { %166 = vst.msk [vmem:[%s325_s1 + $0x10] sm:$0xf] %vm114_vm5, %v130_v40  }
  0x7c   :  { %v57_v41 = vpop.permute.xlu1 %56  }
  0x7d   :  { %59 = vst.msk [vmem:[%s325_s1] sm:$0xff] %vm58_vm3, %v57_v41  }
  0x7f   :  { %v39_v42 = vpop.permute.xlu0 %38  }
  0x80   :  { %143 = vst.msk [vmem:[%s325_s1 + $0x8] sm:$0xff] %vm30_vm2, %v39_v42  }
  0x81   :  { %150 = vst.msk [vmem:[%s325_s1 + $0x8] sm:$0xff] %vm58_vm3, %v67_v35  }
  0x84   :  { %v95_v43 = vpop.permute.xlu1 %94  }
  0x85   :  { %157 = vst.msk [vmem:[%s325_s1 + $0x8] sm:$0xff] %vm86_vm4, %v95_v43  }
  0x87   :  { %v85_v44 = vpop.permute.xlu0 %84  }
  0x88   :  { %87 = vst.msk [vmem:[%s325_s1] sm:$0xff] %vm86_vm4, %v85_v44  }
  0x8c   :  { %v123_v45 = vpop.permute.xlu1 %122  }
  0x8d   :  { %164 = vst.msk [vmem:[%s325_s1 + $0x8] sm:$0xff] %vm114_vm5, %v123_v45  }
  0x8f   :  { %v113_v46 = vpop.permute.xlu0 %112  }
  0x90   :  { %115 = vst.msk [vmem:[%s325_s1] sm:$0xff] %vm114_vm5, %v113_v46  }

// kernel: tile.104
= control target key start
LH: loop header
LB: loop body
LE: loop exit
PB: predicated region body
PF: predicated region fallthrough
CT: control target
= control target key end

     0   :  { %vm4_vm0 = vcmask 1047556   ;;  %s171_s10 = smov 80   ;;  %s172_s25 = smov 60   ;;  %vm6_vm1 = vcmask 162816   ;;  %vm30_vm2 = vcmask 818816   ;;  %vm58_vm3 = vcmask 654816   ;;  %s324_s0 = inlined_call_operand.vmem [shape: f32[20,5,20], index: 0, kind: input, shape index: {}]   ;;  %s325_s1 = inlined_call_operand.vmem [shape: f32[20,100], index: 1, kind: output, shape index: {}]  }
   0x1   :  { %v144_v0 = vld [vmem:[%s324_s0 + $0x84] ss:$8 sm:$0xf]   ;;  %v146_v4 = vld [vmem:[%s324_s0 + $0x3] ss:$8 sm:$0xf]  }
   0x2   :  { %v139_v1 = vld [vmem:[%s324_s0 + $0x4] ss:$8 sm:$0xf]   ;;  %45 = vrot.lane.b32.xlu1 %v144_v0, %s171_s10  ;;  %v147_v5 = vld [vmem:[%s324_s0 + $0x3] ss:$8 sm:$0xf0]  }
   0x3   :  { %v140_v2 = vld [vmem:[%s324_s0 + $0x4] ss:$8 sm:$0xf0]   ;;  %v55_v8 = vsel %vm4_vm0, %v147_v5, %v146_v4  ;;  %v148_v9 = vld [vmem:[%s324_s0 + $0x43] ss:$8 sm:$0xf]  }
   0x4   :  { %v27_v3 = vsel %vm4_vm0, %v140_v2, %v139_v1  ;;  %v141_v6 = vld [vmem:[%s324_s0 + $0x44] ss:$8 sm:$0xf]   ;;  %v149_v10 = vld [vmem:[%s324_s0 + $0x43] ss:$8 sm:$0xf0]  }
   0x5   :  { %28 = vrot.lane.b32.xlu0 %v27_v3, %s171_s10  ;;  %v142_v7 = vld [vmem:[%s324_s0 + $0x44] ss:$8 sm:$0xf0]   ;;  %v65_v11 = vsel %vm4_vm0, %v149_v10, %v148_v9  ;;  %v155_v13 = vld [vmem:[%s324_s0 + $0x42] ss:$8 sm:$0xf]  }
   0x6   :  { %v37_v12 = vsel %vm4_vm0, %v142_v7, %v141_v6  ;;  %66 = vrot.lane.b32.xlu2 %v65_v11, %s172_s25  ;;  %v156_v14 = vld [vmem:[%s324_s0 + $0x42] ss:$8 sm:$0xf0]   ;;  %v151_v17 = vld [vmem:[%s324_s0 + $0x83] ss:$8 sm:$0xf]  }
   0x7   :  { %v153_v15 = vld [vmem:[%s324_s0 + $0x2] ss:$8 sm:$0xf]   ;;  %v93_v18 = vsel %vm4_vm0, %v156_v14, %v155_v13  ;;  %s173_s7 = smov 40   ;;  %s174_s18 = smov 20   ;;  %vm86_vm4 = vcmask 490816  }
   0x8   :  { %v154_v16 = vld [vmem:[%s324_s0 + $0x2] ss:$8 sm:$0xf0]   ;;  %v162_v20 = vld [vmem:[%s324_s0 + $0x41] ss:$8 sm:$0xf]  }
   0x9   :  { %v83_v19 = vsel %vm4_vm0, %v154_v16, %v153_v15  ;;  %v163_v21 = vld [vmem:[%s324_s0 + $0x41] ss:$8 sm:$0xf0]   ;;  %v158_v24 = vld [vmem:[%s324_s0 + $0x82] ss:$8 sm:$0xf]  }
   0xa   :  { %56 = vrot.lane.b32.xlu1 %v55_v8, %s172_s25  ;;  %v160_v22 = vld [vmem:[%s324_s0 + $0x1] ss:$8 sm:$0xf]   ;;  %v121_v25 = vsel %vm4_vm0, %v163_v21, %v162_v20  ;;  %v137_v28 = vld [vmem:[%s324_s0 + $0x80] ss:$8 sm:$0xf]  }
   0xb   :  { %v161_v23 = vld [vmem:[%s324_s0 + $0x1] ss:$8 sm:$0xf0]   ;;  %v2_v29 = vld [vmem:[%s324_s0] ss:$8 sm:$0xf]  }
   0xc   :  { %v111_v26 = vsel %vm4_vm0, %v161_v23, %v160_v22  ;;  %v165_v27 = vld [vmem:[%s324_s0 + $0x81] ss:$8 sm:$0xf]   ;;  %138 = vst.msk [vmem:[%s325_s1 + $0x10] sm:$0xf] %vm6_vm1, %v137_v28   ;;  %vm114_vm5 = vcmask 326816  }
   0xd   :  { %38 = vrot.lane.b32.xlu0 %v37_v12, %s171_s10  ;;  %v3_v30 = vld [vmem:[%s324_s0] ss:$8 sm:$0xf0]  }
   0xe   :  { %73 = vrot.lane.b32.xlu2 %v151_v17, %s172_s25  ;;  %v5_v31 = vsel %vm4_vm0, %v3_v30, %v2_v29  ;;  %v134_v32 = vld [vmem:[%s324_s0 + $0x40] ss:$8 sm:$0xf]  }
   0xf   :  { %7 = vst.msk [vmem:[%s325_s1] sm:$0xff] %vm6_vm1, %v5_v31   ;;  %v135_v33 = vld [vmem:[%s324_s0 + $0x40] ss:$8 sm:$0xf0]  }
  0x10   :  { %v13_v34 = vsel %vm4_vm0, %v135_v33, %v134_v32 }
  0x11   :  { %136 = vst.msk [vmem:[%s325_s1 + $0x8] sm:$0xff] %vm6_vm1, %v13_v34  }
  0x12   :  { %94 = vrot.lane.b32.xlu1 %v93_v18, %s173_s7 }
  0x15   :  { %84 = vrot.lane.b32.xlu0 %v83_v19, %s173_s7 }
  0x16   :  { %101 = vrot.lane.b32.xlu2 %v158_v24, %s173_s7 }
  0x1a   :  { %122 = vrot.lane.b32.xlu1 %v121_v25, %s174_s18 }
  0x1d   :  { %112 = vrot.lane.b32.xlu0 %v111_v26, %s174_s18 }
  0x1e   :  { %129 = vrot.lane.b32.xlu2 %v165_v27, %s174_s18 }
  0x60   :  { %v67_v35 = vpop.permute.xlu2 %66  }
  0x68   :  { %v74_v36 = vpop.permute.xlu2 %73  }
  0x70   :  { %v102_v37 = vpop.permute.xlu2 %101  }
  0x74   :  { %v46_v38 = vpop.permute.xlu1 %45  }
  0x75   :  { %145 = vst.msk [vmem:[%s325_s1 + $0x10] sm:$0xf] %vm30_vm2, %v46_v38  }
  0x76   :  { %152 = vst.msk [vmem:[%s325_s1 + $0x10] sm:$0xf] %vm58_vm3, %v74_v36  }
  0x77   :  { %v29_v39 = vpop.permute.xlu0 %28   ;;  %159 = vst.msk [vmem:[%s325_s1 + $0x10] sm:$0xf] %vm86_vm4, %v102_v37  }
  0x78   :  { %31 = vst.msk [vmem:[%s325_s1] sm:$0xff] %vm30_vm2, %v29_v39   ;;  %v130_v40 = vpop.permute.xlu2 %129  }
  0x79   :  { %166 = vst.msk [vmem:[%s325_s1 + $0x10] sm:$0xf] %vm114_vm5, %v130_v40  }
  0x7c   :  { %v57_v41 = vpop.permute.xlu1 %56  }
  0x7d   :  { %59 = vst.msk [vmem:[%s325_s1] sm:$0xff] %vm58_vm3, %v57_v41  }
  0x7f   :  { %v39_v42 = vpop.permute.xlu0 %38  }
  0x80   :  { %143 = vst.msk [vmem:[%s325_s1 + $0x8] sm:$0xff] %vm30_vm2, %v39_v42  }
  0x81   :  { %150 = vst.msk [vmem:[%s325_s1 + $0x8] sm:$0xff] %vm58_vm3, %v67_v35  }
  0x84   :  { %v95_v43 = vpop.permute.xlu1 %94  }
  0x85   :  { %157 = vst.msk [vmem:[%s325_s1 + $0x8] sm:$0xff] %vm86_vm4, %v95_v43  }
  0x87   :  { %v85_v44 = vpop.permute.xlu0 %84  }
  0x88   :  { %87 = vst.msk [vmem:[%s325_s1] sm:$0xff] %vm86_vm4, %v85_v44  }
  0x8c   :  { %v123_v45 = vpop.permute.xlu1 %122  }
  0x8d   :  { %164 = vst.msk [vmem:[%s325_s1 + $0x8] sm:$0xff] %vm114_vm5, %v123_v45  }
  0x8f   :  { %v113_v46 = vpop.permute.xlu0 %112  }
  0x90   :  { %115 = vst.msk [vmem:[%s325_s1] sm:$0xff] %vm114_vm5, %v113_v46  }

// kernel: tile.58
= control target key start
LH: loop header
LB: loop body
LE: loop exit
PB: predicated region body
PF: predicated region fallthrough
CT: control target
= control target key end

     0   :  { %s22_s0 = inlined_call_operand.vmem [shape: f32[64], index: 0, kind: input, shape index: {}]   ;;  %s23_s1 = inlined_call_operand.vmem [shape: f32[5,64], index: 1, kind: output, shape index: {}]  }
   0x1   :  { %v4_v0 = vld [vmem:[%s22_s0] ss:$0 sm:$0xff] }
   0x2   :  { %5 = vst [vmem:[%s23_s1] sm:$0xff] %v4_v0 }

// kernel: tile.59
= control target key start
LH: loop header
LB: loop body
LE: loop exit
PB: predicated region body
PF: predicated region fallthrough
CT: control target
= control target key end

     0   :  { %s6_s6 = smov 3  ;;  %vm3_vm0 = vcmask 523264   ;;  %vm10_vm1 = vcmask 1048064   ;;  %s60_s0 = inlined_call_operand.vmem [shape: f32[5,64], index: 0, kind: input, shape index: {}]   ;;  %s61_s1 = inlined_call_operand.vmem [shape: f32[1,320], index: 1, kind: output, shape index: {}]  }
   0x1   :  { %v2_v0 = vld [vmem:[%s60_s0] ss:$2 sm:$0x7]   ;;  %v30_v1 = vld [vmem:[%s60_s0 + $0x1] ss:$2 sm:%s6_s6]   ;;  %s34_s0 = smov 64  }
   0x2   :  { %4 = vst.msk [vmem:[#allocation0] ss:$8 sm:$0x7] %vm3_vm0, %v2_v0   ;;  %8 = vrot.lane.b32.xlu0 %v30_v1, %s34_s0 }
   0x9   :  { %v25_v2 = vld [vmem:[#allocation0 + $0x10] sm:$0x1] }
   0xa   :  { %32 = vst [vmem:[%s61_s1 + $0x2] sm:$0x1] %v25_v2 }
  0x74   :  { %v9_v3 = vpop.permute.xlu0 %8  }
  0x75   :  { %11 = vst.msk [vmem:[#allocation0] ss:$8 sm:$0x3] %vm10_vm1, %v9_v3  }
  0x7c   :  { %v14_v4 = vld [vmem:[#allocation0] sm:$0x1]  ;;  %v19_v5 = vld [vmem:[#allocation0 + $0x8] sm:$0x1] }
  0x7d   :  { %17 = vst [vmem:[%s61_s1] sm:$0x1] %v14_v4 }
  0x7e   :  { %31 = vst [vmem:[%s61_s1 + $0x1] sm:$0x1] %v19_v5 }

// kernel: critic_forward.1
= control target key start
LH: loop header
LB: loop body
LE: loop exit
PB: predicated region body
PF: predicated region fallthrough
CT: control target
= control target key end

     0   :  { %vm65_vm0 = vcmask 1042432   ;;  %vm61_vm1 = vcmask 285696   ;;  %vm224_vm2 = vcmask 523264   ;;  %vm669_vm3 = vcmask 1040384   ;;  %s1788_s19 = smov 108   ;;  %s1790_s20 = smov 88   ;;  %s3567_s1 = inlined_call_operand.vmem [shape: f32[35,320], index: 1, kind: input, shape index: {}]   ;;  %s3568_s3 = inlined_call_operand.vmem [shape: f32[320,161], index: 3, kind: input, shape index: {}]   ;;  %s3569_s0 = inlined_call_operand.vmem [shape: f32[8,35], index: 0, kind: input, shape index: {}]   ;;  %s3570_s2 = inlined_call_operand.vmem [shape: f32[1,320], index: 2, kind: input, shape index: {}]   ;;  %s3571_s5 = inlined_call_operand.vmem [shape: f32[161,1892], index: 5, kind: input, shape index: {}]   ;;  %s3572_s4 = inlined_call_operand.vmem [shape: f32[1,161], index: 4, kind: input, shape index: {}]   ;;  %s3573_s6 = inlined_call_operand.vmem [shape: f32[800,100], index: 6, kind: input, shape index: {}]   ;;  %s3574_s7 = inlined_call_operand.vmem [shape: f32[20,100], index: 7, kind: input, shape index: {}]   ;;  %s3575_s8 = inlined_call_operand.vmem [shape: f32[100,20], index: 8, kind: input, shape index: {}]   ;;  %s3576_s9 = inlined_call_operand.<no memory space> [shape: f32[1,1], index: 9, kind: input, shape index: {}]   ;;  %s3577_s10 = inlined_call_operand.vmem [shape: f32[1,1,8], index: 10, kind: output, shape index: {}]  }
   0x1   :  { %v50_v0 = vld [vmem:[%s3567_s1 + $0x60] sm:$0x7]  ;;  %v47_v1 = vld [vmem:[%s3567_s1 + $0x48] sm:$0xff]  ;;  %v44_v3 = vld [vmem:[%s3567_s1 + $0x30] sm:$0xff]  ;;  %vm665_vm4 = vcmask 269312   ;;  %vm1422_vm5 = vcmask 261120  }
   0x2   :  { %1728 = vmatpush.msk.msra.mxu0 %vm65_vm0, %v50_v0  ;;  %v51_v2 = vld [vmem:[%s3567_s1 + $0x68] sm:$0x7]  ;;  %v48_v4 = vld [vmem:[%s3567_s1 + $0x50] sm:$0xff]  ;;  %v45_v5 = vld [vmem:[%s3567_s1 + $0x38] sm:$0xff]  ;;  %vm1590_vm6 = vcmask 1043456   ;;  %vm1586_vm7 = vcmask 162816  }
   0x3   :  { %1730 = vmatpush.msk.msra.mxu1 %vm65_vm0, %v51_v2  ;;  %v41_v6 = vld [vmem:[%s3567_s1 + $0x18] sm:$0xff]  ;;  %v42_v7 = vld [vmem:[%s3567_s1 + $0x20] sm:$0xff]  ;;  %v168_v8 = vld [vmem:[%s3568_s3 + $0xf0] sm:$0xff]  ;;  %vm1630_vm8 = vcmask 818176   ;;  %vm1722_vm9 = vcmask 57344  }
   0x4   :  { %87 = vmatpush.msra.mxu0 %v47_v1  ;;  %v166_v9 = vld [vmem:[%s3568_s3 + $0xe0] sm:$0xff]  ;;  %228 = vmatpush.msra.mxu3 %v168_v8  ;;  %v169_v11 = vld [vmem:[%s3568_s3 + $0xf8] sm:$0xff]  ;;  %v39_v13 = vld [vmem:[%s3567_s1 + $0x8] sm:$0xff] }
   0x5   :  { %107 = vmatpush.msra.mxu1 %v48_v4  ;;  %v38_v10 = vld [vmem:[%s3567_s1] sm:$0xff]  ;;  %288 = vmatpush.msra.mxu2 %v169_v11  ;;  %v167_v14 = vld [vmem:[%s3568_s3 + $0xe8] sm:$0xff]  ;;  %v52_v15 = vld [vmem:[%s3567_s1 + $0x70] sm:$0x7] }
   0x6   :  { %88 = vmatpush.msra.mxu0 %v44_v3  ;;  %v37_v12 = vld [vmem:[%s3569_s0] sm:$0xff]  ;;  %229 = vmatpush.msra.mxu3 %v166_v9  ;;  %v164_v16 = vld [vmem:[%s3568_s3 + $0xd0] sm:$0xff]  ;;  %v49_v18 = vld [vmem:[%s3567_s1 + $0x58] sm:$0xff] }
   0x7   :  { %108 = vmatpush.msra.mxu1 %v45_v5  ;;  %v216_v17 = vld [vmem:[%s3568_s3 + $0x270] sm:$0xff]  ;;  %289 = vmatpush.msra.mxu2 %v167_v14  ;;  %v165_v19 = vld [vmem:[%s3568_s3 + $0xd8] sm:$0xff]  ;;  %v162_v20 = vld [vmem:[%s3568_s3 + $0xc0] sm:$0xff] }
   0x8   :  { %89 = vmatpush.msra.mxu0 %v41_v6  ;;  %v214_v21 = vld [vmem:[%s3568_s3 + $0x260] sm:$0xff]  ;;  %230 = vmatpush.msra.mxu3 %v164_v16  ;;  %v163_v23 = vld [vmem:[%s3568_s3 + $0xc8] sm:$0xff]  ;;  %v160_v24 = vld [vmem:[%s3568_s3 + $0xb0] sm:$0xff] }
   0x9   :  { %109 = vmatpush.msra.mxu1 %v42_v7  ;;  %v46_v22 = vld [vmem:[%s3567_s1 + $0x40] sm:$0xff]  ;;  %290 = vmatpush.msra.mxu2 %v165_v19  ;;  %v212_v25 = vld [vmem:[%s3568_s3 + $0x250] sm:$0xff]  ;;  %v43_v26 = vld [vmem:[%s3567_s1 + $0x28] sm:$0xff] }
   0xa   :  { %90 = vmatpush.msra.mxu0 %v38_v10  ;;  %231 = vmatpush.msra.mxu3 %v162_v20  ;;  %v161_v27 = vld [vmem:[%s3568_s3 + $0xb8] sm:$0xff]  ;;  %v158_v28 = vld [vmem:[%s3568_s3 + $0xa0] sm:$0xff]  ;;  %v40_v30 = vld [vmem:[%s3567_s1 + $0x10] sm:$0xff]  ;;  %s1789_s1 = smov 48  }
   0xb   :  { %1729 = vmatmul.msk.f32.vlgmr.msra.gmra.mxu0 %vm61_vm1, %v37_v12  ;;  %110 = vmatpush.msra.mxu1 %v39_v13  ;;  %v210_v29 = vld [vmem:[%s3568_s3 + $0x240] sm:$0xff]  ;;  %v159_v31 = vld [vmem:[%s3568_s3 + $0xa8] sm:$0xff]  ;;  %v156_v32 = vld [vmem:[%s3568_s3 + $0x90] sm:$0xff] }
   0xc   :  { %1732 = vmatpush.msk.msrb.mxu0 %vm65_vm0, %v52_v15  ;;  %1731 = vmatmul.msk.f32.vlgmr.msra.gmra.mxu1 %vm61_vm1, %v37_v12  ;;  %v200_v33 = vld [vmem:[%s3568_s3 + $0x1f0] sm:$0xff]  ;;  %v154_v35 = vld [vmem:[%s3568_s3 + $0x80] sm:$0xff]  ;;  %v157_v36 = vld [vmem:[%s3568_s3 + $0x98] sm:$0xff] }
   0xd   :  { %276 = vmatpush.msrb.mxu1 %v216_v17  ;;  %291 = vmatpush.msra.mxu2 %v163_v23  ;;  %v208_v34 = vld [vmem:[%s3568_s3 + $0x230] sm:$0xff]  ;;  %v198_v37 = vld [vmem:[%s3568_s3 + $0x1e0] sm:$0xff]  ;;  %v155_v40 = vld [vmem:[%s3568_s3 + $0x88] sm:$0xff] }
   0xe   :  { %127 = vmatpush.msrb.mxu0 %v49_v18  ;;  %232 = vmatpush.msra.mxu3 %v160_v24  ;;  %v206_v38 = vld [vmem:[%s3568_s3 + $0x220] sm:$0xff]  ;;  %v152_v39 = vld [vmem:[%s3568_s3 + $0x70] sm:$0xff]  ;;  %v153_v44 = vld [vmem:[%s3568_s3 + $0x78] sm:$0xff] }
   0xf   :  { %277 = vmatpush.msrb.mxu1 %v214_v21  ;;  %292 = vmatpush.msra.mxu2 %v161_v27  ;;  %v196_v41 = vld [vmem:[%s3568_s3 + $0x1d0] sm:$0xff]  ;;  %v150_v43 = vld [vmem:[%s3568_s3 + $0x60] sm:$0xff]  ;;  %v201_v48 = vld [vmem:[%s3568_s3 + $0x1f8] sm:$0xff] }
  0x10   :  { %128 = vmatpush.msrb.mxu0 %v46_v22  ;;  %233 = vmatpush.msra.mxu3 %v158_v28  ;;  %v204_v42 = vld [vmem:[%s3568_s3 + $0x210] sm:$0xff]  ;;  %v194_v45 = vld [vmem:[%s3568_s3 + $0x1c0] sm:$0xff]  ;;  %v151_v50 = vld [vmem:[%s3568_s3 + $0x68] sm:$0xff] }
  0x11   :  { %278 = vmatpush.msrb.mxu1 %v212_v25  ;;  %293 = vmatpush.msra.mxu2 %v159_v31  ;;  %v202_v46 = vld [vmem:[%s3568_s3 + $0x200] sm:$0xff]  ;;  %v148_v47 = vld [vmem:[%s3568_s3 + $0x50] sm:$0xff]  ;;  %v199_v52 = vld [vmem:[%s3568_s3 + $0x1e8] sm:$0xff] }
  0x12   :  { %129 = vmatpush.msrb.mxu0 %v43_v26  ;;  %234 = vmatpush.msra.mxu3 %v156_v32  ;;  %v192_v49 = vld [vmem:[%s3568_s3 + $0x1b0] sm:$0xff]  ;;  %v146_v51 = vld [vmem:[%s3568_s3 + $0x40] sm:$0xff]  ;;  %v149_v54 = vld [vmem:[%s3568_s3 + $0x58] sm:$0xff] }
  0x13   :  { %279 = vmatpush.msrb.mxu1 %v210_v29  ;;  %294 = vmatpush.msra.mxu2 %v157_v36  ;;  %v190_v53 = vld [vmem:[%s3568_s3 + $0x1a0] sm:$0xff]  ;;  %v144_v55 = vld [vmem:[%s3568_s3 + $0x30] sm:$0xff]  ;;  %v197_v56 = vld [vmem:[%s3568_s3 + $0x1d8] sm:$0xff] }
  0x14   :  { %130 = vmatpush.msrb.mxu0 %v40_v30  ;;  %235 = vmatpush.msra.mxu3 %v154_v35  ;;  %v188_v57 = vld [vmem:[%s3568_s3 + $0x190] sm:$0xff]  ;;  %v147_v58 = vld [vmem:[%s3568_s3 + $0x48] sm:$0xff]  ;;  %v142_v59 = vld [vmem:[%s3568_s3 + $0x20] sm:$0xff] }
  0x15   :  { %1733 = vmatmul.msk.f32.vlgmr.msrb.gmra.mxu0 %vm61_vm1, %v37_v12  ;;  %280 = vmatpush.msrb.mxu1 %v208_v34  ;;  %v195_v60 = vld [vmem:[%s3568_s3 + $0x1c8] sm:$0xff]  ;;  %v186_v61 = vld [vmem:[%s3568_s3 + $0x180] sm:$0xff]  ;;  %v145_v62 = vld [vmem:[%s3568_s3 + $0x38] sm:$0xff] }
  0x16   :  { %248 = vmatpush.msra.mxu0 %v200_v33  ;;  %236 = vmatpush.msra.mxu3 %v152_v39  ;;  %v140_v63 = vld [vmem:[%s3568_s3 + $0x10] sm:$0xff]  ;;  %v193_v0 = vld [vmem:[%s3568_s3 + $0x1b8] sm:$0xff]  ;;  %v138_v2 = vld [vmem:[%s3568_s3] sm:$0xff] }
  0x17   :  { %281 = vmatpush.msrb.mxu1 %v206_v38  ;;  %295 = vmatpush.msra.mxu2 %v155_v40  ;;  %v184_v1 = vld [vmem:[%s3568_s3 + $0x170] sm:$0xff]  ;;  %v217_v3 = vld [vmem:[%s3568_s3 + $0x278] sm:$0xff]  ;;  %v182_v4 = vld [vmem:[%s3568_s3 + $0x160] sm:$0xff] }
  0x18   :  { %249 = vmatpush.msra.mxu0 %v198_v37  ;;  %237 = vmatpush.msra.mxu3 %v150_v43  ;;  %v143_v5 = vld [vmem:[%s3568_s3 + $0x28] sm:$0xff]  ;;  %v180_v8 = vld [vmem:[%s3568_s3 + $0x150] sm:$0xff]  ;;  %v141_v9 = vld [vmem:[%s3568_s3 + $0x18] sm:$0xff] }
  0x19   :  { %282 = vmatpush.msrb.mxu1 %v204_v42  ;;  %296 = vmatpush.msra.mxu2 %v153_v44  ;;  %v191_v6 = vld [vmem:[%s3568_s3 + $0x1a8] sm:$0xff]  ;;  %v189_v10 = vld [vmem:[%s3568_s3 + $0x198] sm:$0xff]  ;;  %v178_v12 = vld [vmem:[%s3568_s3 + $0x140] sm:$0xff] }
  0x1a   :  { %250 = vmatpush.msra.mxu0 %v196_v41  ;;  %238 = vmatpush.msra.mxu3 %v148_v47  ;;  %v215_v7 = vld [vmem:[%s3568_s3 + $0x268] sm:$0xff]  ;;  %v213_v11 = vld [vmem:[%s3568_s3 + $0x258] sm:$0xff]  ;;  %v176_v16 = vld [vmem:[%s3568_s3 + $0x130] sm:$0xff] }
  0x1b   :  { %283 = vmatpush.msrb.mxu1 %v202_v46  ;;  %297 = vmatpush.msra.mxu2 %v151_v50  ;;  %v139_v13 = vld [vmem:[%s3568_s3 + $0x8] sm:$0xff]  ;;  %v185_v17 = vld [vmem:[%s3568_s3 + $0x178] sm:$0xff]  ;;  %v174_v19 = vld [vmem:[%s3568_s3 + $0x120] sm:$0xff] }
  0x1c   :  { %251 = vmatpush.msra.mxu0 %v194_v45  ;;  %239 = vmatpush.msra.mxu3 %v146_v51  ;;  %v187_v14 = vld [vmem:[%s3568_s3 + $0x188] sm:$0xff]  ;;  %v209_v18 = vld [vmem:[%s3568_s3 + $0x238] sm:$0xff]  ;;  %v172_v22 = vld [vmem:[%s3568_s3 + $0x110] sm:$0xff] }
  0x1d   :  { %308 = vmatpush.msra.mxu1 %v201_v48  ;;  %298 = vmatpush.msra.mxu2 %v149_v54  ;;  %v211_v15 = vld [vmem:[%s3568_s3 + $0x248] sm:$0xff]  ;;  %v181_v23 = vld [vmem:[%s3568_s3 + $0x158] sm:$0xff]  ;;  %v170_v25 = vld [vmem:[%s3568_s3 + $0x100] sm:$0xff] }
  0x1e   :  { %252 = vmatpush.msra.mxu0 %v192_v49  ;;  %240 = vmatpush.msra.mxu3 %v144_v55  ;;  %v183_v20 = vld [vmem:[%s3568_s3 + $0x168] sm:$0xff]  ;;  %v205_v24 = vld [vmem:[%s3568_s3 + $0x218] sm:$0xff]  ;;  %v53_v32 = vld [vmem:[%s3570_s2] sm:$0x7] }
  0x1f   :  { %309 = vmatpush.msra.mxu1 %v199_v52  ;;  %299 = vmatpush.msra.mxu2 %v147_v58  ;;  %v207_v21 = vld [vmem:[%s3568_s3 + $0x228] sm:$0xff]  ;;  %v177_v28 = vld [vmem:[%s3568_s3 + $0x138] sm:$0xff]  ;;  %v55_v33 = vperm.slane %v53_v32, 0  ;;  %v56_v34 = vperm.slane %v53_v32, 1  ;;  %v576_v40 = vld [vmem:[%s3571_s5 + $0x710] sm:$0xff]  ;;  %v57_v45 = vperm.slane %v53_v32, 2 }
  0x20   :  { %253 = vmatpush.msra.mxu0 %v190_v53  ;;  %241 = vmatpush.msra.mxu3 %v142_v59  ;;  %v179_v26 = vld [vmem:[%s3568_s3 + $0x148] sm:$0xff]  ;;  %v173_v30 = vld [vmem:[%s3568_s3 + $0x118] sm:$0xff]  ;;  %v560_v44 = vld [vmem:[%s3571_s5 + $0x690] sm:$0xff] }
  0x21   :  { %310 = vmatpush.msra.mxu1 %v197_v56  ;;  %300 = vmatpush.msra.mxu2 %v145_v62  ;;  %v203_v27 = vld [vmem:[%s3568_s3 + $0x208] sm:$0xff]  ;;  %v561_v43 = vld [vmem:[%s3571_s5 + $0x698] sm:$0xff]  ;;  %v546_v46 = vld [vmem:[%s3571_s5 + $0x620] sm:$0xff] }
  0x22   :  { %254 = vmatpush.msra.mxu0 %v188_v57  ;;  %242 = vmatpush.msra.mxu3 %v140_v63  ;;  %v175_v29 = vld [vmem:[%s3568_s3 + $0x128] sm:$0xff]  ;;  %v545_v47 = vld [vmem:[%s3571_s5 + $0x618] sm:$0xff]  ;;  %v530_v50 = vld [vmem:[%s3571_s5 + $0x5a0] sm:$0xff] }
  0x23   :  { %311 = vmatpush.msra.mxu1 %v195_v60  ;;  %301 = vmatpush.msra.mxu2 %v143_v5  ;;  %v171_v31 = vld [vmem:[%s3568_s3 + $0x108] sm:$0xff]  ;;  %v516_v52 = vld [vmem:[%s3571_s5 + $0x530] sm:$0xff]  ;;  %v577_v54 = vld [vmem:[%s3571_s5 + $0x718] sm:$0xff] }
  0x24   :  { %255 = vmatpush.msra.mxu0 %v186_v61  ;;  %243 = vmatpush.msra.mxu3 %v138_v2  ;;  %v575_v42 = vld [vmem:[%s3571_s5 + $0x708] sm:$0xff]  ;;  %v501_v55 = vld [vmem:[%s3571_s5 + $0x4b8] sm:$0xff]  ;;  %v562_v57 = vld [vmem:[%s3571_s5 + $0x6a0] sm:$0xff] }
  0x25   :  { %312 = vmatpush.msra.mxu1 %v193_v0  ;;  %302 = vmatpush.msra.mxu2 %v141_v9  ;;  %v531_v48 = vld [vmem:[%s3571_s5 + $0x5a8] sm:$0xff]  ;;  %v486_v58 = vld [vmem:[%s3571_s5 + $0x440] sm:$0xff]  ;;  %v500_v59 = vld [vmem:[%s3571_s5 + $0x4b0] sm:$0xff] }
  0x26   :  { %256 = vmatpush.msra.mxu0 %v184_v1  ;;  %336 = vmatpush.msrb.mxu3 %v217_v3  ;;  %v515_v56 = vld [vmem:[%s3571_s5 + $0x528] sm:$0xff]  ;;  %v485_v62 = vld [vmem:[%s3571_s5 + $0x438] sm:$0xff]  ;;  %v532_v63 = vld [vmem:[%s3571_s5 + $0x5b0] sm:$0xff] }
  0x27   :  { %313 = vmatpush.msra.mxu1 %v191_v6  ;;  %303 = vmatpush.msra.mxu2 %v139_v13  ;;  %v547_v60 = vld [vmem:[%s3571_s5 + $0x628] sm:$0xff]  ;;  %v456_v0 = vld [vmem:[%s3571_s5 + $0x350] sm:$0xff]  ;;  %v470_v1 = vld [vmem:[%s3571_s5 + $0x3c0] sm:$0xff] }
  0x28   :  { %257 = vmatpush.msra.mxu0 %v182_v4  ;;  %337 = vmatpush.msrb.mxu3 %v215_v7  ;;  %v471_v61 = vld [vmem:[%s3571_s5 + $0x3c8] sm:$0xff]  ;;  %v517_v2 = vld [vmem:[%s3571_s5 + $0x538] sm:$0xff]  ;;  %v502_v5 = vld [vmem:[%s3571_s5 + $0x4c0] sm:$0xff] }
  0x29   :  { %314 = vmatpush.msra.mxu1 %v189_v10  ;;  %v441_v3 = vld [vmem:[%s3571_s5 + $0x2d8] sm:$0xff]  ;;  %v455_v4 = vld [vmem:[%s3571_s5 + $0x348] sm:$0xff]  ;;  %v426_v6 = vld [vmem:[%s3571_s5 + $0x260] sm:$0xff] }
  0x2a   :  { %258 = vmatpush.msra.mxu0 %v180_v8  ;;  %338 = vmatpush.msrb.mxu3 %v213_v11  ;;  %v440_v7 = vld [vmem:[%s3571_s5 + $0x2d0] sm:$0xff]  ;;  %v487_v8 = vld [vmem:[%s3571_s5 + $0x448] sm:$0xff]  ;;  %v425_v10 = vld [vmem:[%s3571_s5 + $0x258] sm:$0xff] }
  0x2b   :  { %315 = vmatpush.msra.mxu1 %v187_v14  ;;  %v411_v9 = vld [vmem:[%s3571_s5 + $0x1e8] sm:$0xff]  ;;  %v472_v11 = vld [vmem:[%s3571_s5 + $0x3d0] sm:$0xff]  ;;  %v410_v13 = vld [vmem:[%s3571_s5 + $0x1e0] sm:$0xff] }
  0x2c   :  { %259 = vmatpush.msra.mxu0 %v178_v12  ;;  %339 = vmatpush.msrb.mxu3 %v211_v15  ;;  %v396_v12 = vld [vmem:[%s3571_s5 + $0x170] sm:$0xff]  ;;  %v457_v14 = vld [vmem:[%s3571_s5 + $0x358] sm:$0xff]  ;;  %v519_v32 = vld [vmem:[%s3571_s5 + $0x548] sm:$0xff] }
  0x2d   :  { %316 = vmatpush.msra.mxu1 %v185_v17  ;;  %v381_v15 = vld [vmem:[%s3571_s5 + $0xf8] sm:$0xff]  ;;  %v442_v17 = vld [vmem:[%s3571_s5 + $0x2e0] sm:$0xff] }
  0x2e   :  { %260 = vmatpush.msra.mxu0 %v176_v16  ;;  %340 = vmatpush.msrb.mxu3 %v209_v18  ;;  %v395_v16 = vld [vmem:[%s3571_s5 + $0x168] sm:$0xff]  ;;  %v366_v18 = vld [vmem:[%s3571_s5 + $0x80] sm:$0xff] }
  0x2f   :  { %317 = vmatpush.msra.mxu1 %v183_v20  ;;  %v427_v20 = vld [vmem:[%s3571_s5 + $0x268] sm:$0xff] }
  0x30   :  { %261 = vmatpush.msra.mxu0 %v174_v19  ;;  %341 = vmatpush.msrb.mxu3 %v207_v21  ;;  %v380_v19 = vld [vmem:[%s3571_s5 + $0xf0] sm:$0xff]  ;;  %v351_v21 = vld [vmem:[%s3571_s5 + $0x8] sm:$0xff] }
  0x31   :  { %318 = vmatpush.msra.mxu1 %v181_v23  ;;  %v365_v23 = vld [vmem:[%s3571_s5 + $0x78] sm:$0xff] }
  0x32   :  { %262 = vmatpush.msra.mxu0 %v172_v22  ;;  %342 = vmatpush.msrb.mxu3 %v205_v24  ;;  %v579_v22 = vld [vmem:[%s3571_s5 + $0x728] sm:$0xff]  ;;  %v412_v24 = vld [vmem:[%s3571_s5 + $0x1f0] sm:$0xff] }
  0x33   :  { %319 = vmatpush.msra.mxu1 %v179_v26  ;;  %v350_v26 = vld [vmem:[%s3571_s5] sm:$0xff] }
  0x34   :  { %263 = vmatpush.msra.mxu0 %v170_v25  ;;  %343 = vmatpush.msrb.mxu3 %v203_v27  ;;  %v564_v25 = vld [vmem:[%s3571_s5 + $0x6b0] sm:$0xff]  ;;  %v397_v27 = vld [vmem:[%s3571_s5 + $0x178] sm:$0xff] }
  0x35   :  { %320 = vmatpush.msra.mxu1 %v177_v28  ;;  %v549_v28 = vld [vmem:[%s3571_s5 + $0x638] sm:$0xff] }
  0x36   :  { %715 = vmatpush.msrb.mxu0 %v575_v42  ;;  %v520_v42 = vld [vmem:[%s3571_s5 + $0x550] sm:$0xff] }
  0x37   :  { %321 = vmatpush.msra.mxu1 %v175_v29  ;;  %v382_v29 = vld [vmem:[%s3571_s5 + $0x100] sm:$0xff] }
  0x38   :  { %716 = vmatpush.msrb.mxu0 %v560_v44  ;;  %v505_v44 = vld [vmem:[%s3571_s5 + $0x4d8] sm:$0xff] }
  0x39   :  { %322 = vmatpush.msra.mxu1 %v173_v30  ;;  %v534_v30 = vld [vmem:[%s3571_s5 + $0x5c0] sm:$0xff] }
  0x3a   :  { %717 = vmatpush.msrb.mxu0 %v545_v47  ;;  %v475_v47 = vld [vmem:[%s3571_s5 + $0x3e8] sm:$0xff] }
  0x3b   :  { %323 = vmatpush.msra.mxu1 %v171_v31  ;;  %v367_v31 = vld [vmem:[%s3571_s5 + $0x88] sm:$0xff] }
  0x3c   :  { %718 = vmatpush.msrb.mxu0 %v530_v50  ;;  %v430_v50 = vld [vmem:[%s3571_s5 + $0x280] sm:$0xff] }
  0x3e   :  { %719 = vmatpush.msrb.mxu0 %v515_v56  ;;  %v638_v56 = vld [vmem:[%s3571_s5 + $0x900] sm:$0xff] }
  0x40   :  { %720 = vmatpush.msrb.mxu0 %v500_v59  ;;  %v620_v59 = vld [vmem:[%s3571_s5 + $0x870] sm:$0xff] }
  0x42   :  { %721 = vmatpush.msrb.mxu0 %v485_v62  ;;  %v385_v62 = vld [vmem:[%s3571_s5 + $0x118] sm:$0xff] }
  0x44   :  { %722 = vmatpush.msrb.mxu0 %v470_v1  ;;  %v369_v1 = vld [vmem:[%s3571_s5 + $0x98] sm:$0xff] }
  0x46   :  { %723 = vmatpush.msrb.mxu0 %v455_v4  ;;  %v593_v4 = vld [vmem:[%s3571_s5 + $0x798] sm:$0xff] }
  0x48   :  { %724 = vmatpush.msrb.mxu0 %v440_v7  ;;  %v651_v7 = vld [vmem:[%s3571_s5 + $0x968] sm:$0x1] }
  0x4a   :  { %725 = vmatpush.msrb.mxu0 %v425_v10  ;;  %v606_v10 = vld [vmem:[%s3571_s5 + $0x800] sm:$0xff] }
  0x4c   :  { %726 = vmatpush.msrb.mxu0 %v410_v13 }
  0x4e   :  { %727 = vmatpush.msrb.mxu0 %v395_v16 }
  0x50   :  { %728 = vmatpush.msrb.mxu0 %v380_v19 }
  0x52   :  { %729 = vmatpush.msrb.mxu0 %v365_v23 }
  0x54   :  { %730 = vmatpush.msrb.mxu0 %v350_v26  ;;  %v639_v26 = vld [vmem:[%s3571_s5 + $0x908] sm:$0xff] }
  0x88   :  { %v92_v35 = vpop.f32.mrf.mxu0 }
  0x89   :  { %v93_v36 = vadd.f32 %v92_v35, %v55_v33  ;;  %v112_v37 = vpop.f32.mrf.mxu1  ;;  %v352_v33 = vld [vmem:[%s3571_s5 + $0x10] sm:$0xff] }
  0x8a   :  { %v113_v38 = vadd.f32 %v112_v37, %v56_v34  ;;  %v580_v34 = vld [vmem:[%s3571_s5 + $0x730] sm:$0xff]  ;;  %v489_v37 = vld [vmem:[%s3571_s5 + $0x458] sm:$0xff] }
  0x8b   :  { %v135_v39 = vmax.f32 %v93_v36, 0.0  ;;  %v504_v35 = vld [vmem:[%s3571_s5 + $0x4d0] sm:$0xff]  ;;  %v565_v36 = vld [vmem:[%s3571_s5 + $0x6b8] sm:$0xff] }
  0x8c   :  { %v136_v41 = vmax.f32 %v113_v38, 0.0  ;;  %v550_v38 = vld [vmem:[%s3571_s5 + $0x640] sm:$0xff] }
  0x8d   :  { %244 = vmatmul.f32.vlgmr.msra.gmra.mxu3 %v135_v39  ;;  %304 = vmatmul.f32.vlgmr.msra.gmra.mxu2 %v135_v39  ;;  %v474_v39 = vld [vmem:[%s3571_s5 + $0x3e0] sm:$0xff] }
  0x8e   :  { %264 = vmatmul.f32.vlgmr.msra.gmra.mxu0 %v136_v41  ;;  %755 = vmatpush.msra.mxu3 %v576_v40  ;;  %v535_v40 = vld [vmem:[%s3571_s5 + $0x5c8] sm:$0xff] }
  0x90   :  { %756 = vmatpush.msra.mxu3 %v561_v43  ;;  %v444_v43 = vld [vmem:[%s3571_s5 + $0x2f0] sm:$0xff] }
  0x92   :  { %v132_v49 = vpop.f32.mrf.mxu0  ;;  %757 = vmatpush.msra.mxu3 %v546_v46  ;;  %v490_v46 = vld [vmem:[%s3571_s5 + $0x460] sm:$0xff] }
  0x93   :  { %v133_v51 = vadd.f32 %v132_v49, %v57_v45  ;;  %v429_v45 = vld [vmem:[%s3571_s5 + $0x278] sm:$0xff] }
  0x94   :  { %758 = vmatpush.msra.mxu3 %v531_v48  ;;  %v460_v48 = vld [vmem:[%s3571_s5 + $0x370] sm:$0xff]  ;;  %v445_v49 = vld [vmem:[%s3571_s5 + $0x2f8] sm:$0xff] }
  0x95   :  { %v137_v53 = vmax.f32 %v133_v51, 0.0  ;;  %v650_v51 = vld [vmem:[%s3571_s5 + $0x960] sm:$0x1] }
  0x96   :  { %759 = vmatpush.msra.mxu3 %v516_v52  ;;  %v653_v52 = vld [vmem:[%s3571_s5 + $0x978] sm:$0x1]  ;;  %1736 = vmatpush.msk.msrb.mxu2 %vm669_vm3, %v650_v51 }
  0x97   :  { %1734 = vmatmul.msk.f32.vlgmr.msrb.gmra.mxu1 %vm224_vm2, %v137_v53  ;;  %1735 = vmatmul.msk.f32.vlgmr.msrb.gmra.mxu3 %vm224_vm2, %v137_v53  ;;  %v414_v53 = vld [vmem:[%s3571_s5 + $0x200] sm:$0xff]  ;;  %v493_v51 = vld [vmem:[%s3571_s5 + $0x478] sm:$0xff] }
  0x98   :  { %795 = vmatpush.msrb.mxu1 %v577_v54  ;;  %760 = vmatpush.msra.mxu3 %v501_v55  ;;  %v415_v54 = vld [vmem:[%s3571_s5 + $0x208] sm:$0xff] }
  0x99   :  { %1742 = vmatpush.msk.msra.mxu0 %vm669_vm3, %v653_v52  ;;  %v635_v55 = vld [vmem:[%s3571_s5 + $0x8e8] sm:$0xff]  ;;  %v622_v52 = vld [vmem:[%s3571_s5 + $0x880] sm:$0xff] }
  0x9a   :  { %796 = vmatpush.msrb.mxu1 %v562_v57  ;;  %761 = vmatpush.msra.mxu3 %v486_v58  ;;  %v399_v57 = vld [vmem:[%s3571_s5 + $0x188] sm:$0xff]  ;;  %v400_v58 = vld [vmem:[%s3571_s5 + $0x190] sm:$0xff] }
  0x9b   :  { %747 = vmatpush.msrb.mxu2 %v635_v55  ;;  %867 = vmatpush.msra.mxu0 %v638_v56  ;;  %v478_v55 = vld [vmem:[%s3571_s5 + $0x400] sm:$0xff]  ;;  %v607_v56 = vld [vmem:[%s3571_s5 + $0x808] sm:$0xff] }
  0x9c   :  { %797 = vmatpush.msrb.mxu1 %v547_v60  ;;  %762 = vmatpush.msra.mxu3 %v471_v61  ;;  %v623_v60 = vld [vmem:[%s3571_s5 + $0x888] sm:$0xff]  ;;  %v384_v61 = vld [vmem:[%s3571_s5 + $0x110] sm:$0xff] }
  0x9d   :  { %748 = vmatpush.msrb.mxu2 %v620_v59  ;;  %868 = vmatpush.msra.mxu0 %v623_v60  ;;  %v463_v59 = vld [vmem:[%s3571_s5 + $0x388] sm:$0xff]  ;;  %v592_v60 = vld [vmem:[%s3571_s5 + $0x790] sm:$0xff] }
  0x9e   :  { %798 = vmatpush.msrb.mxu1 %v532_v63  ;;  %763 = vmatpush.msra.mxu3 %v456_v0  ;;  %v605_v63 = vld [vmem:[%s3571_s5 + $0x7f8] sm:$0xff]  ;;  %v608_v0 = vld [vmem:[%s3571_s5 + $0x810] sm:$0xff] }
  0x9f   :  { %324 = vmatmul.f32.vlgmr.msra.gmra.mxu1 %v136_v41  ;;  %v459_v41 = vld [vmem:[%s3571_s5 + $0x368] sm:$0xff]  ;;  %749 = vmatpush.msrb.mxu2 %v605_v63  ;;  %v581_v63 = vld [vmem:[%s3571_s5 + $0x738] sm:$0xff] }
  0xa0   :  { %799 = vmatpush.msrb.mxu1 %v517_v2  ;;  %764 = vmatpush.msra.mxu3 %v441_v3  ;;  %v370_v2 = vld [vmem:[%s3571_s5 + $0xa0] sm:$0xff] }
  0xa1   :  { %869 = vmatpush.msra.mxu0 %v608_v0  ;;  %v590_v3 = vld [vmem:[%s3571_s5 + $0x780] sm:$0xff]  ;;  %v447_v0 = vld [vmem:[%s3571_s5 + $0x308] sm:$0xff] }
  0xa2   :  { %800 = vmatpush.msrb.mxu1 %v502_v5  ;;  %765 = vmatpush.msra.mxu3 %v426_v6  ;;  %v354_v5 = vld [vmem:[%s3571_s5 + $0x20] sm:$0xff]  ;;  %v355_v6 = vld [vmem:[%s3571_s5 + $0x28] sm:$0xff] }
  0xa3   :  { %750 = vmatpush.msrb.mxu2 %v590_v3  ;;  %870 = vmatpush.msra.mxu0 %v593_v4  ;;  %v566_v3 = vld [vmem:[%s3571_s5 + $0x6c0] sm:$0xff]  ;;  %v432_v4 = vld [vmem:[%s3571_s5 + $0x290] sm:$0xff] }
  0xa4   :  { %801 = vmatpush.msrb.mxu1 %v487_v8  ;;  %766 = vmatpush.msra.mxu3 %v411_v9  ;;  %v636_v8 = vld [vmem:[%s3571_s5 + $0x8f0] sm:$0xff]  ;;  %v621_v9 = vld [vmem:[%s3571_s5 + $0x878] sm:$0xff] }
  0xa5   :  { %1738 = vmatpush.msk.msra.mxu2 %vm669_vm3, %v651_v7  ;;  %v551_v7 = vld [vmem:[%s3571_s5 + $0x648] sm:$0xff] }
  0xa6   :  { %802 = vmatpush.msrb.mxu1 %v472_v11  ;;  %767 = vmatpush.msra.mxu3 %v396_v12  ;;  %v591_v11 = vld [vmem:[%s3571_s5 + $0x788] sm:$0xff]  ;;  %v218_v12 = vld [vmem:[%s3572_s4] sm:$0x3] }
  0xa7   :  { %787 = vmatpush.msra.mxu2 %v636_v8  ;;  %v220_v13 = vperm.slane %v218_v12, 0  ;;  %v417_v8 = vld [vmem:[%s3571_s5 + $0x218] sm:$0xff] }
  0xa8   :  { %803 = vmatpush.msrb.mxu1 %v457_v14  ;;  %768 = vmatpush.msra.mxu3 %v381_v15 }
  0xa9   :  { %788 = vmatpush.msra.mxu2 %v621_v9  ;;  %v418_v9 = vld [vmem:[%s3571_s5 + $0x220] sm:$0xff] }
  0xaa   :  { %804 = vmatpush.msrb.mxu1 %v442_v17  ;;  %769 = vmatpush.msra.mxu3 %v366_v18 }
  0xab   :  { %789 = vmatpush.msra.mxu2 %v606_v10  ;;  %v533_v10 = vld [vmem:[%s3571_s5 + $0x5b8] sm:$0xff] }
  0xac   :  { %805 = vmatpush.msrb.mxu1 %v427_v20  ;;  %770 = vmatpush.msra.mxu3 %v351_v21  ;;  %v221_v20 = vperm.slane %v218_v12, 1  ;;  %v402_v12 = vld [vmem:[%s3571_s5 + $0x1a0] sm:$0xff] }
  0xad   :  { %790 = vmatpush.msra.mxu2 %v591_v11  ;;  %v536_v11 = vld [vmem:[%s3571_s5 + $0x5d0] sm:$0xff] }
  0xae   :  { %875 = vmatpush.msrb.mxu3 %v579_v22  ;;  %806 = vmatpush.msrb.mxu1 %v412_v24  ;;  %v654_v22 = vld [vmem:[%s3571_s5 + $0x980] sm:$0x1] }
  0xaf   :  { %v582_v24 = vld [vmem:[%s3571_s5 + $0x740] sm:$0xff] }
  0xb0   :  { %876 = vmatpush.msrb.mxu3 %v564_v25  ;;  %807 = vmatpush.msrb.mxu1 %v397_v27  ;;  %v583_v25 = vld [vmem:[%s3571_s5 + $0x748] sm:$0xff] }
  0xb1   :  { %v567_v27 = vld [vmem:[%s3571_s5 + $0x6c8] sm:$0xff] }
  0xb2   :  { %877 = vmatpush.msrb.mxu3 %v549_v28  ;;  %808 = vmatpush.msrb.mxu1 %v382_v29  ;;  %v568_v28 = vld [vmem:[%s3571_s5 + $0x6d0] sm:$0xff] }
  0xb4   :  { %878 = vmatpush.msrb.mxu3 %v534_v30  ;;  %809 = vmatpush.msrb.mxu1 %v367_v31  ;;  %v624_v30 = vld [vmem:[%s3571_s5 + $0x890] sm:$0xff] }
  0xb6   :  { %879 = vmatpush.msrb.mxu3 %v519_v32  ;;  %810 = vmatpush.msrb.mxu1 %v352_v33  ;;  %v552_v32 = vld [vmem:[%s3571_s5 + $0x650] sm:$0xff]  ;;  %v553_v33 = vld [vmem:[%s3571_s5 + $0x658] sm:$0xff] }
  0xb8   :  { %915 = vmatpush.msra.mxu1 %v580_v34  ;;  %880 = vmatpush.msrb.mxu3 %v504_v35  ;;  %v609_v35 = vld [vmem:[%s3571_s5 + $0x818] sm:$0xff] }
  0xba   :  { %916 = vmatpush.msra.mxu1 %v565_v36  ;;  %881 = vmatpush.msrb.mxu3 %v489_v37  ;;  %v537_v37 = vld [vmem:[%s3571_s5 + $0x5d8] sm:$0xff] }
  0xbc   :  { %917 = vmatpush.msra.mxu1 %v550_v38  ;;  %882 = vmatpush.msrb.mxu3 %v474_v39  ;;  %v538_v38 = vld [vmem:[%s3571_s5 + $0x5e0] sm:$0xff] }
  0xbe   :  { %918 = vmatpush.msra.mxu1 %v535_v40  ;;  %883 = vmatpush.msrb.mxu3 %v459_v41  ;;  %v594_v40 = vld [vmem:[%s3571_s5 + $0x7a0] sm:$0xff] }
  0xbf   :  { %v522_v41 = vld [vmem:[%s3571_s5 + $0x560] sm:$0xff] }
  0xc0   :  { %919 = vmatpush.msra.mxu1 %v520_v42  ;;  %884 = vmatpush.msrb.mxu3 %v444_v43  ;;  %v523_v43 = vld [vmem:[%s3571_s5 + $0x568] sm:$0xff] }
  0xc2   :  { %920 = vmatpush.msra.mxu1 %v505_v44  ;;  %885 = vmatpush.msrb.mxu3 %v429_v45  ;;  %v652_v44 = vld [vmem:[%s3571_s5 + $0x970] sm:$0x1]  ;;  %v655_v45 = vld [vmem:[%s3571_s5 + $0x988] sm:$0x1] }
  0xc4   :  { %921 = vmatpush.msra.mxu1 %v490_v46  ;;  %886 = vmatpush.msrb.mxu3 %v414_v53  ;;  %v507_v46 = vld [vmem:[%s3571_s5 + $0x4e8] sm:$0xff]  ;;  %v625_v53 = vld [vmem:[%s3571_s5 + $0x898] sm:$0xff] }
  0xc6   :  { %922 = vmatpush.msra.mxu1 %v475_v47  ;;  %887 = vmatpush.msrb.mxu3 %v399_v57  ;;  %v508_v47 = vld [vmem:[%s3571_s5 + $0x4f0] sm:$0xff]  ;;  %v610_v57 = vld [vmem:[%s3571_s5 + $0x820] sm:$0xff] }
  0xc8   :  { %923 = vmatpush.msra.mxu1 %v460_v48  ;;  %888 = vmatpush.msrb.mxu3 %v384_v61  ;;  %v637_v48 = vld [vmem:[%s3571_s5 + $0x8f8] sm:$0xff]  ;;  %v595_v61 = vld [vmem:[%s3571_s5 + $0x7a8] sm:$0xff] }
  0xca   :  { %924 = vmatpush.msra.mxu1 %v445_v49  ;;  %889 = vmatpush.msrb.mxu3 %v369_v1  ;;  %v640_v49 = vld [vmem:[%s3571_s5 + $0x910] sm:$0xff] }
  0xcb   :  { %v448_v1 = vld [vmem:[%s3571_s5 + $0x310] sm:$0xff] }
  0xcc   :  { %925 = vmatpush.msra.mxu1 %v430_v50  ;;  %890 = vmatpush.msrb.mxu3 %v354_v5  ;;  %v492_v50 = vld [vmem:[%s3571_s5 + $0x470] sm:$0xff]  ;;  %v433_v5 = vld [vmem:[%s3571_s5 + $0x298] sm:$0xff] }
  0xce   :  { %926 = vmatpush.msra.mxu1 %v415_v54  ;;  %v477_v54 = vld [vmem:[%s3571_s5 + $0x3f8] sm:$0xff] }
  0xd0   :  { %927 = vmatpush.msra.mxu1 %v400_v58  ;;  %v462_v58 = vld [vmem:[%s3571_s5 + $0x380] sm:$0xff] }
  0xd2   :  { %928 = vmatpush.msra.mxu1 %v385_v62  ;;  %v578_v62 = vld [vmem:[%s3571_s5 + $0x720] sm:$0xff] }
  0xd4   :  { %929 = vmatpush.msra.mxu1 %v370_v2  ;;  %v563_v2 = vld [vmem:[%s3571_s5 + $0x6a8] sm:$0xff] }
  0xd6   :  { %930 = vmatpush.msra.mxu1 %v355_v6  ;;  %v548_v6 = vld [vmem:[%s3571_s5 + $0x630] sm:$0xff] }
 0x10b   :  { %v265_v15 = vpop.f32.mrf.mxu0 }
 0x110   :  { %v245_v14 = vpop.f32.mrf.mxu3  ;;  %v305_v23 = vpop.f32.mrf.mxu2 }
 0x111   :  { %v246_v16 = vadd.f32 %v245_v14, %v220_v13  ;;  %v306_v29 = vadd.f32 %v305_v23, %v221_v20  ;;  %v403_v13 = vld [vmem:[%s3571_s5 + $0x1a8] sm:$0xff]  ;;  %v518_v14 = vld [vmem:[%s3571_s5 + $0x540] sm:$0xff]  ;;  %v372_v20 = vld [vmem:[%s3571_s5 + $0xb0] sm:$0xff] }
 0x112   :  { %v488_v23 = vld [vmem:[%s3571_s5 + $0x450] sm:$0xff] }
 0x113   :  { %v266_v17 = vadd.f32 %v265_v15, %v246_v16  ;;  %v521_v15 = vld [vmem:[%s3571_s5 + $0x558] sm:$0xff]  ;;  %v387_v16 = vld [vmem:[%s3571_s5 + $0x128] sm:$0xff] }
 0x114   :  { %v285_v18 = vpop.f32.mrf.mxu1 }
 0x115   :  { %v286_v19 = vadd.f32 %v285_v18, %v266_v17  ;;  %v388_v17 = vld [vmem:[%s3571_s5 + $0x130] sm:$0xff]  ;;  %v503_v18 = vld [vmem:[%s3571_s5 + $0x4c8] sm:$0xff] }
 0x117   :  { %v2436_v21 = vmax.f32 %v286_v19, 0.0  ;;  %v506_v19 = vld [vmem:[%s3571_s5 + $0x4e0] sm:$0xff] }
 0x119   :  { %731 = vmatmul.f32.vlgmr.msrb.gmra.mxu0 %v2436_v21  ;;  %771 = vmatmul.f32.vlgmr.msra.gmra.mxu3 %v2436_v21 }
 0x11a   :  { %811 = vmatmul.f32.vlgmr.msrb.gmra.mxu1 %v2436_v21  ;;  %1744 = vmatpush.msk.msrb.mxu0 %vm669_vm3, %v654_v22  ;;  %v345_v36 = vpop.f32.mrf.mxu3  ;;  %v373_v22 = vld [vmem:[%s3571_s5 + $0xb8] sm:$0xff] }
 0x11b   :  { %995 = vmatpush.msra.mxu3 %v582_v24  ;;  %1035 = vmatpush.msrb.mxu1 %v583_v25  ;;  %v491_v24 = vld [vmem:[%s3571_s5 + $0x468] sm:$0xff]  ;;  %v357_v25 = vld [vmem:[%s3571_s5 + $0x38] sm:$0xff] }
 0x11c   :  { %v325_v31 = vpop.f32.mrf.mxu1  ;;  %907 = vmatpush.msrb.mxu0 %v639_v26  ;;  %v358_v26 = vld [vmem:[%s3571_s5 + $0x40] sm:$0xff] }
 0x11d   :  { %v326_v34 = vadd.f32 %v325_v31, %v306_v29  ;;  %996 = vmatpush.msra.mxu3 %v567_v27  ;;  %1036 = vmatpush.msrb.mxu1 %v568_v28  ;;  %v585_v27 = vld [vmem:[%s3571_s5 + $0x758] sm:$0xff]  ;;  %v586_v28 = vld [vmem:[%s3571_s5 + $0x760] sm:$0xff] }
 0x11e   :  { %908 = vmatpush.msrb.mxu0 %v624_v30  ;;  %v473_v29 = vld [vmem:[%s3571_s5 + $0x3d8] sm:$0xff]  ;;  %v476_v30 = vld [vmem:[%s3571_s5 + $0x3f0] sm:$0xff]  ;;  %v570_v31 = vld [vmem:[%s3571_s5 + $0x6e0] sm:$0xff] }
 0x11f   :  { %v346_v39 = vadd.f32 %v345_v36, %v326_v34  ;;  %997 = vmatpush.msra.mxu3 %v552_v32  ;;  %1037 = vmatpush.msrb.mxu1 %v553_v33  ;;  %v571_v32 = vld [vmem:[%s3571_s5 + $0x6e8] sm:$0xff]  ;;  %v458_v33 = vld [vmem:[%s3571_s5 + $0x360] sm:$0xff]  ;;  %v461_v34 = vld [vmem:[%s3571_s5 + $0x378] sm:$0xff] }
 0x120   :  { %909 = vmatpush.msrb.mxu0 %v609_v35  ;;  %v555_v35 = vld [vmem:[%s3571_s5 + $0x668] sm:$0xff]  ;;  %v556_v36 = vld [vmem:[%s3571_s5 + $0x670] sm:$0xff] }
 0x121   :  { %v2484_v42 = vmax.f32 %v346_v39, 0.0  ;;  %998 = vmatpush.msra.mxu3 %v537_v37  ;;  %1038 = vmatpush.msrb.mxu1 %v538_v38  ;;  %v443_v37 = vld [vmem:[%s3571_s5 + $0x2e8] sm:$0xff]  ;;  %v446_v38 = vld [vmem:[%s3571_s5 + $0x300] sm:$0xff]  ;;  %v540_v39 = vld [vmem:[%s3571_s5 + $0x5f0] sm:$0xff] }
 0x122   :  { %891 = vmatmul.f32.vlgmr.msrb.gmra.mxu3 %v2436_v21  ;;  %910 = vmatpush.msrb.mxu0 %v594_v40  ;;  %v541_v40 = vld [vmem:[%s3571_s5 + $0x5f8] sm:$0xff] }
 0x123   :  { %931 = vmatmul.f32.vlgmr.msra.gmra.mxu1 %v2436_v21  ;;  %999 = vmatpush.msra.mxu3 %v522_v41  ;;  %v428_v41 = vld [vmem:[%s3571_s5 + $0x270] sm:$0xff] }
 0x124   :  { %1039 = vmatpush.msrb.mxu1 %v523_v43  ;;  %1737 = vmatmul.msk.f32.vlgmr.msrb.gmra.mxu2 %vm665_vm4, %v2484_v42  ;;  %v431_v43 = vld [vmem:[%s3571_s5 + $0x288] sm:$0xff] }
 0x125   :  { %1740 = vmatpush.msk.msrb.mxu2 %vm669_vm3, %v652_v44  ;;  %1743 = vmatmul.msk.f32.vlgmr.msra.gmra.mxu0 %vm665_vm4, %v2484_v42  ;;  %v525_v44 = vld [vmem:[%s3571_s5 + $0x578] sm:$0xff] }
 0x126   :  { %1746 = vmatpush.msk.msra.mxu0 %vm669_vm3, %v655_v45  ;;  %1000 = vmatpush.msra.mxu3 %v507_v46  ;;  %v526_v45 = vld [vmem:[%s3571_s5 + $0x580] sm:$0xff]  ;;  %v413_v46 = vld [vmem:[%s3571_s5 + $0x1f8] sm:$0xff] }
 0x127   :  { %1040 = vmatpush.msrb.mxu1 %v508_v47  ;;  %827 = vmatpush.msrb.mxu2 %v637_v48  ;;  %v416_v47 = vld [vmem:[%s3571_s5 + $0x210] sm:$0xff]  ;;  %v510_v48 = vld [vmem:[%s3571_s5 + $0x500] sm:$0xff] }
 0x128   :  { %947 = vmatpush.msra.mxu0 %v640_v49  ;;  %1001 = vmatpush.msra.mxu3 %v492_v50  ;;  %v511_v49 = vld [vmem:[%s3571_s5 + $0x508] sm:$0xff]  ;;  %v398_v50 = vld [vmem:[%s3571_s5 + $0x180] sm:$0xff] }
 0x129   :  { %1041 = vmatpush.msrb.mxu1 %v493_v51  ;;  %828 = vmatpush.msrb.mxu2 %v622_v52  ;;  %v401_v51 = vld [vmem:[%s3571_s5 + $0x198] sm:$0xff]  ;;  %v495_v52 = vld [vmem:[%s3571_s5 + $0x488] sm:$0xff] }
 0x12a   :  { %948 = vmatpush.msra.mxu0 %v625_v53  ;;  %1002 = vmatpush.msra.mxu3 %v477_v54  ;;  %v496_v53 = vld [vmem:[%s3571_s5 + $0x490] sm:$0xff]  ;;  %v383_v54 = vld [vmem:[%s3571_s5 + $0x108] sm:$0xff] }
 0x12b   :  { %1042 = vmatpush.msrb.mxu1 %v478_v55  ;;  %829 = vmatpush.msrb.mxu2 %v607_v56  ;;  %v386_v55 = vld [vmem:[%s3571_s5 + $0x120] sm:$0xff]  ;;  %v480_v56 = vld [vmem:[%s3571_s5 + $0x410] sm:$0xff] }
 0x12c   :  { %949 = vmatpush.msra.mxu0 %v610_v57  ;;  %1003 = vmatpush.msra.mxu3 %v462_v58  ;;  %v481_v57 = vld [vmem:[%s3571_s5 + $0x418] sm:$0xff]  ;;  %v368_v58 = vld [vmem:[%s3571_s5 + $0x90] sm:$0xff] }
 0x12d   :  { %1043 = vmatpush.msrb.mxu1 %v463_v59  ;;  %1739 = vmatmul.msk.f32.vlgmr.msra.gmra.mxu2 %vm665_vm4, %v2484_v42  ;;  %v371_v59 = vld [vmem:[%s3571_s5 + $0xa8] sm:$0xff] }
 0x12e   :  { %830 = vmatpush.msrb.mxu2 %v592_v60  ;;  %1745 = vmatmul.msk.f32.vlgmr.msrb.gmra.mxu0 %vm665_vm4, %v2484_v42  ;;  %v465_v60 = vld [vmem:[%s3571_s5 + $0x398] sm:$0xff] }
 0x12f   :  { %950 = vmatpush.msra.mxu0 %v595_v61  ;;  %1004 = vmatpush.msra.mxu3 %v447_v0  ;;  %v466_v61 = vld [vmem:[%s3571_s5 + $0x3a0] sm:$0xff]  ;;  %v656_v0 = vld [vmem:[%s3571_s5 + $0x990] sm:$0x1] }
 0x130   :  { %835 = vmatpush.msra.mxu2 %v578_v62  ;;  %1044 = vmatpush.msrb.mxu1 %v448_v1  ;;  %v353_v62 = vld [vmem:[%s3571_s5 + $0x18] sm:$0xff]  ;;  %v659_v1 = vld [vmem:[%s3571_s5 + $0x9a8] sm:$0x1] }
 0x131   :  { %955 = vmatpush.msrb.mxu0 %v581_v63  ;;  %1005 = vmatpush.msra.mxu3 %v432_v4  ;;  %v356_v63 = vld [vmem:[%s3571_s5 + $0x30] sm:$0xff]  ;;  %v641_v4 = vld [vmem:[%s3571_s5 + $0x918] sm:$0xff] }
 0x132   :  { %836 = vmatpush.msra.mxu2 %v563_v2  ;;  %1045 = vmatpush.msrb.mxu1 %v433_v5  ;;  %v450_v2 = vld [vmem:[%s3571_s5 + $0x320] sm:$0xff]  ;;  %v644_v5 = vld [vmem:[%s3571_s5 + $0x930] sm:$0xff] }
 0x133   :  { %956 = vmatpush.msrb.mxu0 %v566_v3  ;;  %1006 = vmatpush.msra.mxu3 %v417_v8  ;;  %v451_v3 = vld [vmem:[%s3571_s5 + $0x328] sm:$0xff]  ;;  %v626_v8 = vld [vmem:[%s3571_s5 + $0x8a0] sm:$0xff] }
 0x134   :  { %837 = vmatpush.msra.mxu2 %v548_v6  ;;  %1046 = vmatpush.msrb.mxu1 %v418_v9  ;;  %v435_v6 = vld [vmem:[%s3571_s5 + $0x2a8] sm:$0xff]  ;;  %v629_v9 = vld [vmem:[%s3571_s5 + $0x8b8] sm:$0xff] }
 0x135   :  { %957 = vmatpush.msrb.mxu0 %v551_v7  ;;  %1007 = vmatpush.msra.mxu3 %v402_v12  ;;  %v436_v7 = vld [vmem:[%s3571_s5 + $0x2b0] sm:$0xff]  ;;  %v611_v12 = vld [vmem:[%s3571_s5 + $0x828] sm:$0xff] }
 0x136   :  { %838 = vmatpush.msra.mxu2 %v533_v10  ;;  %1047 = vmatpush.msrb.mxu1 %v403_v13  ;;  %v420_v10 = vld [vmem:[%s3571_s5 + $0x230] sm:$0xff]  ;;  %v614_v13 = vld [vmem:[%s3571_s5 + $0x840] sm:$0xff] }
 0x137   :  { %958 = vmatpush.msrb.mxu0 %v536_v11  ;;  %1741 = vmatmul.msk.f32.vlgmr.msrb.gmra.mxu2 %vm665_vm4, %v2484_v42  ;;  %v421_v11 = vld [vmem:[%s3571_s5 + $0x238] sm:$0xff] }
 0x138   :  { %1747 = vmatmul.msk.f32.vlgmr.msra.gmra.mxu0 %vm665_vm4, %v2484_v42  ;;  %839 = vmatpush.msra.mxu2 %v518_v14  ;;  %v405_v14 = vld [vmem:[%s3571_s5 + $0x1b8] sm:$0xff] }
 0x139   :  { %959 = vmatpush.msrb.mxu0 %v521_v15  ;;  %1008 = vmatpush.msra.mxu3 %v387_v16  ;;  %v406_v15 = vld [vmem:[%s3571_s5 + $0x1c0] sm:$0xff]  ;;  %v596_v16 = vld [vmem:[%s3571_s5 + $0x7b0] sm:$0xff] }
 0x13a   :  { %1048 = vmatpush.msrb.mxu1 %v388_v17  ;;  %840 = vmatpush.msra.mxu2 %v503_v18  ;;  %v599_v17 = vld [vmem:[%s3571_s5 + $0x7c8] sm:$0xff]  ;;  %v390_v18 = vld [vmem:[%s3571_s5 + $0x140] sm:$0xff] }
 0x13b   :  { %960 = vmatpush.msrb.mxu0 %v506_v19  ;;  %1009 = vmatpush.msra.mxu3 %v372_v20  ;;  %v391_v19 = vld [vmem:[%s3571_s5 + $0x148] sm:$0xff]  ;;  %v657_v20 = vld [vmem:[%s3571_s5 + $0x998] sm:$0x1] }
 0x13c   :  { %1049 = vmatpush.msrb.mxu1 %v373_v22  ;;  %841 = vmatpush.msra.mxu2 %v488_v23  ;;  %v660_v22 = vld [vmem:[%s3571_s5 + $0x9b0] sm:$0x1]  ;;  %v375_v23 = vld [vmem:[%s3571_s5 + $0xc8] sm:$0xff] }
 0x13d   :  { %961 = vmatpush.msrb.mxu0 %v491_v24  ;;  %1010 = vmatpush.msra.mxu3 %v357_v25  ;;  %v376_v24 = vld [vmem:[%s3571_s5 + $0xd0] sm:$0xff]  ;;  %v642_v25 = vld [vmem:[%s3571_s5 + $0x920] sm:$0xff] }
 0x13e   :  { %1050 = vmatpush.msrb.mxu1 %v358_v26  ;;  %1011 = vmatmul.f32.vlgmr.msra.gmra.mxu3 %v2436_v21  ;;  %v645_v26 = vld [vmem:[%s3571_s5 + $0x938] sm:$0xff] }
 0x13f   :  { %1051 = vmatmul.f32.vlgmr.msrb.gmra.mxu1 %v2436_v21  ;;  %1115 = vmatpush.msrb.mxu3 %v585_v27  ;;  %v360_v27 = vld [vmem:[%s3571_s5 + $0x50] sm:$0xff] }
 0x140   :  { %1155 = vmatpush.msra.mxu1 %v586_v28  ;;  %842 = vmatpush.msra.mxu2 %v473_v29  ;;  %v361_v28 = vld [vmem:[%s3571_s5 + $0x58] sm:$0xff]  ;;  %v627_v29 = vld [vmem:[%s3571_s5 + $0x8a8] sm:$0xff] }
 0x141   :  { %962 = vmatpush.msrb.mxu0 %v476_v30  ;;  %1116 = vmatpush.msrb.mxu3 %v570_v31  ;;  %v630_v30 = vld [vmem:[%s3571_s5 + $0x8c0] sm:$0xff]  ;;  %v663_v31 = vld [vmem:[%s3571_s5 + $0x9c8] sm:$0x1] }
 0x142   :  { %1156 = vmatpush.msra.mxu1 %v571_v32  ;;  %843 = vmatpush.msra.mxu2 %v458_v33  ;;  %v589_v32 = vld [vmem:[%s3571_s5 + $0x778] sm:$0xff]  ;;  %v612_v33 = vld [vmem:[%s3571_s5 + $0x830] sm:$0xff] }
 0x143   :  { %963 = vmatpush.msrb.mxu0 %v461_v34  ;;  %1117 = vmatpush.msrb.mxu3 %v555_v35  ;;  %v615_v34 = vld [vmem:[%s3571_s5 + $0x848] sm:$0xff]  ;;  %v648_v35 = vld [vmem:[%s3571_s5 + $0x950] sm:$0xff] }
 0x144   :  { %1157 = vmatpush.msra.mxu1 %v556_v36  ;;  %844 = vmatpush.msra.mxu2 %v443_v37  ;;  %v574_v36 = vld [vmem:[%s3571_s5 + $0x700] sm:$0xff]  ;;  %v597_v37 = vld [vmem:[%s3571_s5 + $0x7b8] sm:$0xff] }
 0x145   :  { %964 = vmatpush.msrb.mxu0 %v446_v38  ;;  %1118 = vmatpush.msrb.mxu3 %v540_v39  ;;  %v600_v38 = vld [vmem:[%s3571_s5 + $0x7d0] sm:$0xff]  ;;  %v633_v39 = vld [vmem:[%s3571_s5 + $0x8d8] sm:$0xff] }
 0x146   :  { %1158 = vmatpush.msra.mxu1 %v541_v40  ;;  %845 = vmatpush.msra.mxu2 %v428_v41  ;;  %v559_v40 = vld [vmem:[%s3571_s5 + $0x688] sm:$0xff]  ;;  %v658_v41 = vld [vmem:[%s3571_s5 + $0x9a0] sm:$0x1] }
 0x147   :  { %965 = vmatpush.msrb.mxu0 %v431_v43  ;;  %1119 = vmatpush.msrb.mxu3 %v525_v44  ;;  %v661_v43 = vld [vmem:[%s3571_s5 + $0x9b8] sm:$0x1]  ;;  %v618_v44 = vld [vmem:[%s3571_s5 + $0x860] sm:$0xff] }
 0x148   :  { %1159 = vmatpush.msra.mxu1 %v526_v45  ;;  %846 = vmatpush.msra.mxu2 %v413_v46  ;;  %v544_v45 = vld [vmem:[%s3571_s5 + $0x610] sm:$0xff]  ;;  %v643_v46 = vld [vmem:[%s3571_s5 + $0x928] sm:$0xff] }
 0x149   :  { %966 = vmatpush.msrb.mxu0 %v416_v47  ;;  %1120 = vmatpush.msrb.mxu3 %v510_v48  ;;  %v646_v47 = vld [vmem:[%s3571_s5 + $0x940] sm:$0xff]  ;;  %v603_v48 = vld [vmem:[%s3571_s5 + $0x7e8] sm:$0xff] }
 0x14a   :  { %1160 = vmatpush.msra.mxu1 %v511_v49  ;;  %847 = vmatpush.msra.mxu2 %v398_v50  ;;  %v529_v49 = vld [vmem:[%s3571_s5 + $0x598] sm:$0xff]  ;;  %v628_v50 = vld [vmem:[%s3571_s5 + $0x8b0] sm:$0xff] }
 0x14b   :  { %967 = vmatpush.msrb.mxu0 %v401_v51  ;;  %1121 = vmatpush.msrb.mxu3 %v495_v52  ;;  %v631_v51 = vld [vmem:[%s3571_s5 + $0x8c8] sm:$0xff]  ;;  %v664_v52 = vld [vmem:[%s3571_s5 + $0x9d0] sm:$0x1] }
 0x14c   :  { %1161 = vmatpush.msra.mxu1 %v496_v53  ;;  %848 = vmatpush.msra.mxu2 %v383_v54  ;;  %v514_v53 = vld [vmem:[%s3571_s5 + $0x520] sm:$0xff]  ;;  %v613_v54 = vld [vmem:[%s3571_s5 + $0x838] sm:$0xff] }
 0x14d   :  { %968 = vmatpush.msrb.mxu0 %v386_v55  ;;  %1122 = vmatpush.msrb.mxu3 %v480_v56  ;;  %v616_v55 = vld [vmem:[%s3571_s5 + $0x850] sm:$0xff]  ;;  %v649_v56 = vld [vmem:[%s3571_s5 + $0x958] sm:$0xff] }
 0x14e   :  { %1162 = vmatpush.msra.mxu1 %v481_v57  ;;  %849 = vmatpush.msra.mxu2 %v368_v58  ;;  %v499_v57 = vld [vmem:[%s3571_s5 + $0x4a8] sm:$0xff]  ;;  %v598_v58 = vld [vmem:[%s3571_s5 + $0x7c0] sm:$0xff] }
 0x14f   :  { %969 = vmatpush.msrb.mxu0 %v371_v59  ;;  %1123 = vmatpush.msrb.mxu3 %v465_v60  ;;  %v601_v59 = vld [vmem:[%s3571_s5 + $0x7d8] sm:$0xff]  ;;  %v634_v60 = vld [vmem:[%s3571_s5 + $0x8e0] sm:$0xff] }
 0x150   :  { %1163 = vmatpush.msra.mxu1 %v466_v61  ;;  %850 = vmatpush.msra.mxu2 %v353_v62  ;;  %v584_v61 = vld [vmem:[%s3571_s5 + $0x750] sm:$0xff]  ;;  %v587_v62 = vld [vmem:[%s3571_s5 + $0x768] sm:$0xff] }
 0x151   :  { %970 = vmatpush.msrb.mxu0 %v356_v63  ;;  %851 = vmatmul.f32.vlgmr.msra.gmra.mxu2 %v2436_v21  ;;  %v484_v63 = vld [vmem:[%s3571_s5 + $0x430] sm:$0xff] }
 0x152   :  { %971 = vmatmul.f32.vlgmr.msrb.gmra.mxu0 %v2436_v21  ;;  %1748 = vmatpush.msk.msrb.mxu2 %vm669_vm3, %v656_v0  ;;  %v619_v0 = vld [vmem:[%s3571_s5 + $0x868] sm:$0xff] }
 0x153   :  { %1754 = vmatpush.msk.msra.mxu0 %vm669_vm3, %v659_v1  ;;  %1124 = vmatpush.msrb.mxu3 %v450_v2  ;;  %v569_v1 = vld [vmem:[%s3571_s5 + $0x6d8] sm:$0xff]  ;;  %v572_v2 = vld [vmem:[%s3571_s5 + $0x6f0] sm:$0xff] }
 0x154   :  { %1164 = vmatpush.msra.mxu1 %v451_v3  ;;  %987 = vmatpush.msrb.mxu2 %v641_v4  ;;  %v469_v3 = vld [vmem:[%s3571_s5 + $0x3b8] sm:$0xff]  ;;  %v604_v4 = vld [vmem:[%s3571_s5 + $0x7f0] sm:$0xff] }
 0x155   :  { %1107 = vmatpush.msra.mxu0 %v644_v5  ;;  %1125 = vmatpush.msrb.mxu3 %v435_v6  ;;  %v554_v5 = vld [vmem:[%s3571_s5 + $0x660] sm:$0xff]  ;;  %v557_v6 = vld [vmem:[%s3571_s5 + $0x678] sm:$0xff] }
 0x156   :  { %1165 = vmatpush.msra.mxu1 %v436_v7  ;;  %988 = vmatpush.msrb.mxu2 %v626_v8  ;;  %v454_v7 = vld [vmem:[%s3571_s5 + $0x340] sm:$0xff]  ;;  %v539_v8 = vld [vmem:[%s3571_s5 + $0x5e8] sm:$0xff] }
 0x157   :  { %1108 = vmatpush.msra.mxu0 %v629_v9  ;;  %1126 = vmatpush.msrb.mxu3 %v420_v10  ;;  %v542_v9 = vld [vmem:[%s3571_s5 + $0x600] sm:$0xff]  ;;  %v439_v10 = vld [vmem:[%s3571_s5 + $0x2c8] sm:$0xff] }
 0x158   :  { %1166 = vmatpush.msra.mxu1 %v421_v11  ;;  %989 = vmatpush.msrb.mxu2 %v611_v12  ;;  %v524_v11 = vld [vmem:[%s3571_s5 + $0x570] sm:$0xff]  ;;  %v527_v12 = vld [vmem:[%s3571_s5 + $0x588] sm:$0xff] }
 0x159   :  { %1109 = vmatpush.msra.mxu0 %v614_v13  ;;  %1127 = vmatpush.msrb.mxu3 %v405_v14  ;;  %v424_v13 = vld [vmem:[%s3571_s5 + $0x250] sm:$0xff]  ;;  %v509_v14 = vld [vmem:[%s3571_s5 + $0x4f8] sm:$0xff] }
 0x15a   :  { %1167 = vmatpush.msra.mxu1 %v406_v15  ;;  %990 = vmatpush.msrb.mxu2 %v596_v16  ;;  %v512_v15 = vld [vmem:[%s3571_s5 + $0x510] sm:$0xff]  ;;  %v409_v16 = vld [vmem:[%s3571_s5 + $0x1d8] sm:$0xff] }
 0x15b   :  { %1110 = vmatpush.msra.mxu0 %v599_v17  ;;  %1128 = vmatpush.msrb.mxu3 %v390_v18  ;;  %v494_v17 = vld [vmem:[%s3571_s5 + $0x480] sm:$0xff]  ;;  %v497_v18 = vld [vmem:[%s3571_s5 + $0x498] sm:$0xff] }
 0x15c   :  { %1168 = vmatpush.msra.mxu1 %v391_v19  ;;  %1749 = vmatmul.msk.f32.vlgmr.msrb.gmra.mxu2 %vm665_vm4, %v2484_v42  ;;  %v394_v19 = vld [vmem:[%s3571_s5 + $0x160] sm:$0xff] }
 0x15d   :  { %1750 = vmatpush.msk.msra.mxu2 %vm669_vm3, %v657_v20  ;;  %1755 = vmatmul.msk.f32.vlgmr.msra.gmra.mxu0 %vm665_vm4, %v2484_v42  ;;  %v479_v20 = vld [vmem:[%s3571_s5 + $0x408] sm:$0xff] }
 0x15e   :  { %1756 = vmatpush.msk.msrb.mxu0 %vm669_vm3, %v660_v22  ;;  %1129 = vmatpush.msrb.mxu3 %v375_v23  ;;  %v482_v22 = vld [vmem:[%s3571_s5 + $0x420] sm:$0xff]  ;;  %v379_v23 = vld [vmem:[%s3571_s5 + $0xe8] sm:$0xff] }
 0x15f   :  { %1169 = vmatpush.msra.mxu1 %v376_v24  ;;  %1027 = vmatpush.msra.mxu2 %v642_v25  ;;  %v464_v24 = vld [vmem:[%s3571_s5 + $0x390] sm:$0xff]  ;;  %v467_v25 = vld [vmem:[%s3571_s5 + $0x3a8] sm:$0xff] }
 0x160   :  { %1147 = vmatpush.msrb.mxu0 %v645_v26  ;;  %1130 = vmatpush.msrb.mxu3 %v360_v27  ;;  %v364_v26 = vld [vmem:[%s3571_s5 + $0x70] sm:$0xff]  ;;  %v449_v27 = vld [vmem:[%s3571_s5 + $0x318] sm:$0xff] }
 0x161   :  { %1170 = vmatpush.msra.mxu1 %v361_v28  ;;  %1028 = vmatpush.msra.mxu2 %v627_v29  ;;  %v452_v28 = vld [vmem:[%s3571_s5 + $0x330] sm:$0xff]  ;;  %v434_v29 = vld [vmem:[%s3571_s5 + $0x2a0] sm:$0xff] }
 0x162   :  { %1131 = vmatmul.f32.vlgmr.msrb.gmra.mxu3 %v2436_v21  ;;  %1148 = vmatpush.msrb.mxu0 %v630_v30  ;;  %v437_v30 = vld [vmem:[%s3571_s5 + $0x2b8] sm:$0xff] }
 0x163   :  { %1171 = vmatmul.f32.vlgmr.msra.gmra.mxu1 %v2436_v21  ;;  %1762 = vmatpush.msk.msra.mxu3 %vm669_vm3, %v663_v31  ;;  %v419_v31 = vld [vmem:[%s3571_s5 + $0x228] sm:$0xff] }
 0x164   :  { %1275 = vmatpush.msrb.mxu1 %v589_v32  ;;  %1029 = vmatpush.msra.mxu2 %v612_v33  ;;  %v422_v32 = vld [vmem:[%s3571_s5 + $0x240] sm:$0xff]  ;;  %v404_v33 = vld [vmem:[%s3571_s5 + $0x1b0] sm:$0xff] }
 0x165   :  { %1149 = vmatpush.msrb.mxu0 %v615_v34  ;;  %1267 = vmatpush.msra.mxu3 %v648_v35  ;;  %v407_v34 = vld [vmem:[%s3571_s5 + $0x1c8] sm:$0xff]  ;;  %v389_v35 = vld [vmem:[%s3571_s5 + $0x138] sm:$0xff] }
 0x166   :  { %1276 = vmatpush.msrb.mxu1 %v574_v36  ;;  %1030 = vmatpush.msra.mxu2 %v597_v37  ;;  %v392_v36 = vld [vmem:[%s3571_s5 + $0x150] sm:$0xff]  ;;  %v374_v37 = vld [vmem:[%s3571_s5 + $0xc0] sm:$0xff] }
 0x167   :  { %1150 = vmatpush.msrb.mxu0 %v600_v38  ;;  %1268 = vmatpush.msra.mxu3 %v633_v39  ;;  %v377_v38 = vld [vmem:[%s3571_s5 + $0xd8] sm:$0xff]  ;;  %v359_v39 = vld [vmem:[%s3571_s5 + $0x48] sm:$0xff] }
 0x168   :  { %1277 = vmatpush.msrb.mxu1 %v559_v40  ;;  %1751 = vmatmul.msk.f32.vlgmr.msra.gmra.mxu2 %vm665_vm4, %v2484_v42  ;;  %v362_v40 = vld [vmem:[%s3571_s5 + $0x60] sm:$0xff] }
 0x169   :  { %1752 = vmatpush.msk.msrb.mxu2 %vm669_vm3, %v658_v41  ;;  %1757 = vmatmul.msk.f32.vlgmr.msrb.gmra.mxu0 %vm665_vm4, %v2484_v42  ;;  %v662_v41 = vld [vmem:[%s3571_s5 + $0x9c0] sm:$0x1] }
 0x16a   :  { %1758 = vmatpush.msk.msra.mxu0 %vm669_vm3, %v661_v43  ;;  %1269 = vmatpush.msra.mxu3 %v618_v44  ;;  %v647_v43 = vld [vmem:[%s3571_s5 + $0x948] sm:$0xff]  ;;  %v632_v44 = vld [vmem:[%s3571_s5 + $0x8d0] sm:$0xff] }
 0x16b   :  { %1278 = vmatpush.msrb.mxu1 %v544_v45  ;;  %1067 = vmatpush.msrb.mxu2 %v643_v46  ;;  %v617_v45 = vld [vmem:[%s3571_s5 + $0x858] sm:$0xff]  ;;  %v602_v46 = vld [vmem:[%s3571_s5 + $0x7e0] sm:$0xff] }
 0x16c   :  { %1187 = vmatpush.msra.mxu0 %v646_v47  ;;  %1270 = vmatpush.msra.mxu3 %v603_v48  ;;  %v588_v47 = vld [vmem:[%s3571_s5 + $0x770] sm:$0xff]  ;;  %v573_v48 = vld [vmem:[%s3571_s5 + $0x6f8] sm:$0xff] }
 0x16d   :  { %1279 = vmatpush.msrb.mxu1 %v529_v49  ;;  %1068 = vmatpush.msrb.mxu2 %v628_v50  ;;  %v1337_v49 = vld [vmem:[%s3573_s6 + $0x78] sm:$0xff]  ;;  %v1336_v50 = vld [vmem:[%s3573_s6 + $0x70] sm:$0xff] }
 0x16e   :  { %1188 = vmatpush.msra.mxu0 %v631_v51  ;;  %1763 = vmatmul.msk.f32.vlgmr.msra.gmra.mxu3 %vm665_vm4, %v2484_v42  ;;  %v558_v51 = vld [vmem:[%s3571_s5 + $0x680] sm:$0xff] }
 0x16f   :  { %1764 = vmatpush.msk.msrb.mxu3 %vm669_vm3, %v664_v52  ;;  %1280 = vmatpush.msrb.mxu1 %v514_v53  ;;  %v543_v52 = vld [vmem:[%s3571_s5 + $0x608] sm:$0xff]  ;;  %v1334_v53 = vld [vmem:[%s3573_s6 + $0x60] sm:$0xff] }
 0x170   :  { %1069 = vmatpush.msrb.mxu2 %v613_v54  ;;  %1189 = vmatpush.msra.mxu0 %v616_v55  ;;  %v1385_v54 = vld [vmem:[%s3573_s6 + $0x1f8] sm:$0xff]  ;;  %v1384_v55 = vld [vmem:[%s3573_s6 + $0x1f0] sm:$0xff] }
 0x171   :  { %1307 = vmatpush.msrb.mxu3 %v649_v56  ;;  %1281 = vmatpush.msrb.mxu1 %v499_v57  ;;  %v528_v56 = vld [vmem:[%s3571_s5 + $0x590] sm:$0xff]  ;;  %v1333_v57 = vld [vmem:[%s3573_s6 + $0x58] sm:$0xff] }
 0x172   :  { %1070 = vmatpush.msrb.mxu2 %v598_v58  ;;  %1190 = vmatpush.msra.mxu0 %v601_v59  ;;  %v1383_v58 = vld [vmem:[%s3573_s6 + $0x1e8] sm:$0xff]  ;;  %v513_v59 = vld [vmem:[%s3571_s5 + $0x518] sm:$0xff] }
 0x173   :  { %1308 = vmatpush.msrb.mxu3 %v634_v60  ;;  %1753 = vmatmul.msk.f32.vlgmr.msrb.gmra.mxu2 %vm665_vm4, %v2484_v42  ;;  %v1332_v60 = vld [vmem:[%s3573_s6 + $0x50] sm:$0xff] }
 0x174   :  { %1075 = vmatpush.msra.mxu2 %v584_v61  ;;  %1759 = vmatmul.msk.f32.vlgmr.msra.gmra.mxu0 %vm665_vm4, %v2484_v42  ;;  %v1382_v61 = vld [vmem:[%s3573_s6 + $0x1e0] sm:$0xff] }
 0x175   :  { %1195 = vmatpush.msrb.mxu0 %v587_v62  ;;  %1282 = vmatpush.msrb.mxu1 %v484_v63  ;;  %v498_v62 = vld [vmem:[%s3571_s5 + $0x4a0] sm:$0xff]  ;;  %v1331_v63 = vld [vmem:[%s3573_s6 + $0x48] sm:$0xff] }
 0x176   :  { %1309 = vmatpush.msrb.mxu3 %v619_v0  ;;  %1076 = vmatpush.msra.mxu2 %v569_v1  ;;  %v483_v0 = vld [vmem:[%s3571_s5 + $0x428] sm:$0xff]  ;;  %v1330_v1 = vld [vmem:[%s3573_s6 + $0x40] sm:$0xff] }
 0x177   :  { %1196 = vmatpush.msrb.mxu0 %v572_v2  ;;  %1283 = vmatpush.msrb.mxu1 %v469_v3  ;;  %v468_v2 = vld [vmem:[%s3571_s5 + $0x3b0] sm:$0xff]  ;;  %v1329_v3 = vld [vmem:[%s3573_s6 + $0x38] sm:$0xff] }
 0x178   :  { %1310 = vmatpush.msrb.mxu3 %v604_v4  ;;  %1077 = vmatpush.msra.mxu2 %v554_v5  ;;  %v453_v5 = vld [vmem:[%s3571_s5 + $0x338] sm:$0xff] }
 0x179   :  { %1197 = vmatpush.msrb.mxu0 %v557_v6  ;;  %1284 = vmatpush.msrb.mxu1 %v454_v7  ;;  %v1328_v6 = vld [vmem:[%s3573_s6 + $0x30] sm:$0xff]  ;;  %v438_v7 = vld [vmem:[%s3571_s5 + $0x2c0] sm:$0xff] }
 0x17a   :  { %1765 = vmatmul.msk.f32.vlgmr.msrb.gmra.mxu3 %vm665_vm4, %v2484_v42  ;;  %1078 = vmatpush.msra.mxu2 %v539_v8  ;;  %v1327_v8 = vld [vmem:[%s3573_s6 + $0x28] sm:$0xff] }
 0x17b   :  { %1198 = vmatpush.msrb.mxu0 %v542_v9  ;;  %1285 = vmatpush.msrb.mxu1 %v439_v10  ;;  %v1381_v9 = vld [vmem:[%s3573_s6 + $0x1d8] sm:$0xff]  ;;  %v1380_v10 = vld [vmem:[%s3573_s6 + $0x1d0] sm:$0xff] }
 0x17c   :  { %1079 = vmatpush.msra.mxu2 %v524_v11  ;;  %1426 = vmatpush.msra.mxu3 %v1337_v49  ;;  %v423_v11 = vld [vmem:[%s3571_s5 + $0x248] sm:$0xff] }
 0x17d   :  { %1199 = vmatpush.msrb.mxu0 %v527_v12  ;;  %1286 = vmatpush.msrb.mxu1 %v424_v13  ;;  %v1326_v12 = vld [vmem:[%s3573_s6 + $0x20] sm:$0xff]  ;;  %v1379_v13 = vld [vmem:[%s3573_s6 + $0x1c8] sm:$0xff] }
 0x17e   :  { %1080 = vmatpush.msra.mxu2 %v509_v14  ;;  %1427 = vmatpush.msra.mxu3 %v1336_v50  ;;  %v408_v14 = vld [vmem:[%s3571_s5 + $0x1d0] sm:$0xff]  ;;  %v1346_v50 = vld [vmem:[%s3573_s6 + $0xc0] sm:$0xff] }
 0x17f   :  { %1200 = vmatpush.msrb.mxu0 %v512_v15  ;;  %1287 = vmatpush.msrb.mxu1 %v409_v16  ;;  %v1325_v15 = vld [vmem:[%s3573_s6 + $0x18] sm:$0xff] }
 0x180   :  { %1081 = vmatpush.msra.mxu2 %v494_v17  ;;  %v393_v16 = vld [vmem:[%s3571_s5 + $0x158] sm:$0xff]  ;;  %v1324_v17 = vld [vmem:[%s3573_s6 + $0x10] sm:$0xff] }
 0x181   :  { %1201 = vmatpush.msrb.mxu0 %v497_v18  ;;  %1288 = vmatpush.msrb.mxu1 %v394_v19  ;;  %v1353_v18 = vld [vmem:[%s3573_s6 + $0xf8] sm:$0xff]  ;;  %v1378_v19 = vld [vmem:[%s3573_s6 + $0x1c0] sm:$0xff] }
 0x182   :  { %1082 = vmatpush.msra.mxu2 %v479_v20 }
 0x183   :  { %1202 = vmatpush.msrb.mxu0 %v482_v22  ;;  %1289 = vmatpush.msrb.mxu1 %v379_v23  ;;  %v378_v22 = vld [vmem:[%s3571_s5 + $0xe0] sm:$0xff]  ;;  %v1323_v23 = vld [vmem:[%s3573_s6 + $0x8] sm:$0xff] }
 0x184   :  { %1083 = vmatpush.msra.mxu2 %v464_v24 }
 0x185   :  { %1203 = vmatpush.msrb.mxu0 %v467_v25  ;;  %1290 = vmatpush.msrb.mxu1 %v364_v26  ;;  %v363_v25 = vld [vmem:[%s3571_s5 + $0x68] sm:$0xff]  ;;  %v1322_v26 = vld [vmem:[%s3573_s6] sm:$0xff] }
 0x186   :  { %1291 = vmatmul.f32.vlgmr.msrb.gmra.mxu1 %v2436_v21  ;;  %1084 = vmatpush.msra.mxu2 %v449_v27  ;;  %v1401_v27 = vld [vmem:[%s3573_s6 + $0x278] sm:$0xff] }
 0x187   :  { %1204 = vmatpush.msrb.mxu0 %v452_v28  ;;  %1486 = vmatpush.msra.mxu1 %v1385_v54  ;;  %v1352_v28 = vld [vmem:[%s3573_s6 + $0xf0] sm:$0xff]  ;;  %v1370_v54 = vld [vmem:[%s3573_s6 + $0x180] sm:$0xff] }
 0x188   :  { %1085 = vmatpush.msra.mxu2 %v434_v29  ;;  %v1377_v29 = vld [vmem:[%s3573_s6 + $0x1b8] sm:$0xff] }
 0x189   :  { %1205 = vmatpush.msrb.mxu0 %v437_v30  ;;  %1487 = vmatpush.msra.mxu1 %v1384_v55  ;;  %v1351_v30 = vld [vmem:[%s3573_s6 + $0xe8] sm:$0xff] }
 0x18a   :  { %1086 = vmatpush.msra.mxu2 %v419_v31  ;;  %v1376_v31 = vld [vmem:[%s3573_s6 + $0x1b0] sm:$0xff] }
 0x18b   :  { %1206 = vmatpush.msrb.mxu0 %v422_v32  ;;  %1488 = vmatpush.msra.mxu1 %v1383_v58  ;;  %v1400_v32 = vld [vmem:[%s3573_s6 + $0x270] sm:$0xff]  ;;  %v1391_v58 = vld [vmem:[%s3573_s6 + $0x228] sm:$0xff] }
 0x18c   :  { %1087 = vmatpush.msra.mxu2 %v404_v33  ;;  %v1399_v33 = vld [vmem:[%s3573_s6 + $0x268] sm:$0xff] }
 0x18d   :  { %1207 = vmatpush.msrb.mxu0 %v407_v34  ;;  %1489 = vmatpush.msra.mxu1 %v1382_v61  ;;  %v1390_v61 = vld [vmem:[%s3573_s6 + $0x220] sm:$0xff] }
 0x18e   :  { %1088 = vmatpush.msra.mxu2 %v389_v35  ;;  %v1398_v35 = vld [vmem:[%s3573_s6 + $0x260] sm:$0xff] }
 0x18f   :  { %1208 = vmatpush.msrb.mxu0 %v392_v36  ;;  %1490 = vmatpush.msra.mxu1 %v1381_v9  ;;  %v1350_v36 = vld [vmem:[%s3573_s6 + $0xe0] sm:$0xff] }
 0x190   :  { %1089 = vmatpush.msra.mxu2 %v374_v37  ;;  %v1349_v37 = vld [vmem:[%s3573_s6 + $0xd8] sm:$0xff]  ;;  %v1386_v9 = vld [vmem:[%s3573_s6 + $0x200] sm:$0xff] }
 0x191   :  { %1209 = vmatpush.msrb.mxu0 %v377_v38  ;;  %1491 = vmatpush.msra.mxu1 %v1380_v10  ;;  %v1374_v38 = vld [vmem:[%s3573_s6 + $0x1a0] sm:$0xff] }
 0x192   :  { %1090 = vmatpush.msra.mxu2 %v359_v39  ;;  %v1397_v39 = vld [vmem:[%s3573_s6 + $0x258] sm:$0xff] }
 0x193   :  { %1210 = vmatpush.msrb.mxu0 %v362_v40  ;;  %1091 = vmatmul.f32.vlgmr.msra.gmra.mxu2 %v2436_v21  ;;  %v1348_v40 = vld [vmem:[%s3573_s6 + $0xd0] sm:$0xff] }
 0x194   :  { %1211 = vmatmul.f32.vlgmr.msrb.gmra.mxu0 %v2436_v21  ;;  %1760 = vmatpush.msk.msrb.mxu2 %vm669_vm3, %v662_v41 }
 0x195   :  { %1492 = vmatpush.msra.mxu1 %v1379_v13  ;;  %1446 = vmatpush.msra.mxu0 %v1353_v18  ;;  %v1369_v13 = vld [vmem:[%s3573_s6 + $0x178] sm:$0xff] }
 0x196   :  { %1227 = vmatpush.msrb.mxu2 %v647_v43  ;;  %v3174_v4 = vpop.f32.mrf.mxu0  ;;  %v1373_v43 = vld [vmem:[%s3573_s6 + $0x198] sm:$0xff] }
 0x197   :  { %1493 = vmatpush.msra.mxu1 %v1378_v19  ;;  %1447 = vmatpush.msra.mxu0 %v1352_v28  ;;  %v1366_v19 = vld [vmem:[%s3573_s6 + $0x160] sm:$0xff] }
 0x198   :  { %1228 = vmatpush.msrb.mxu2 %v632_v44  ;;  %v1396_v44 = vld [vmem:[%s3573_s6 + $0x250] sm:$0xff] }
 0x199   :  { %1494 = vmatpush.msra.mxu1 %v1377_v29  ;;  %1448 = vmatpush.msra.mxu0 %v1351_v30  ;;  %v1415_v29 = vld [vmem:[%s3573_s6 + $0x2e8] sm:$0xff] }
 0x19a   :  { %1229 = vmatpush.msrb.mxu2 %v617_v45  ;;  %v1395_v45 = vld [vmem:[%s3573_s6 + $0x248] sm:$0xff] }
 0x19b   :  { %1495 = vmatpush.msra.mxu1 %v1376_v31  ;;  %1449 = vmatpush.msra.mxu0 %v1350_v36 }
 0x19c   :  { %1230 = vmatpush.msrb.mxu2 %v602_v46  ;;  %v1347_v46 = vld [vmem:[%s3573_s6 + $0xc8] sm:$0xff] }
 0x19d   :  { %1761 = vmatmul.msk.f32.vlgmr.msrb.gmra.mxu2 %vm665_vm4, %v2484_v42  ;;  %v1335_v42 = vld [vmem:[%s3573_s6 + $0x68] sm:$0xff]  ;;  %1450 = vmatpush.msra.mxu0 %v1349_v37 }
 0x19e   :  { %1235 = vmatpush.msra.mxu2 %v588_v47  ;;  %1428 = vmatpush.msra.mxu3 %v1335_v42  ;;  %v1372_v47 = vld [vmem:[%s3573_s6 + $0x190] sm:$0xff]  ;;  %v1393_v42 = vld [vmem:[%s3573_s6 + $0x238] sm:$0xff] }
 0x19f   :  { %1451 = vmatpush.msra.mxu0 %v1348_v40 }
 0x1a0   :  { %1236 = vmatpush.msra.mxu2 %v573_v48  ;;  %1429 = vmatpush.msra.mxu3 %v1334_v53  ;;  %v1394_v48 = vld [vmem:[%s3573_s6 + $0x240] sm:$0xff]  ;;  %v1345_v53 = vld [vmem:[%s3573_s6 + $0xb8] sm:$0xff] }
 0x1a1   :  { %1452 = vmatpush.msra.mxu0 %v1347_v46 }
 0x1a2   :  { %1237 = vmatpush.msra.mxu2 %v558_v51  ;;  %1430 = vmatpush.msra.mxu3 %v1333_v57  ;;  %v3221_v20 = vpop.f32.mrf.mxu0  ;;  %v1371_v51 = vld [vmem:[%s3573_s6 + $0x188] sm:$0xff]  ;;  %v1344_v57 = vld [vmem:[%s3573_s6 + $0xb0] sm:$0xff] }
 0x1a3   :  { %1453 = vmatpush.msra.mxu0 %v1346_v50 }
 0x1a4   :  { %1238 = vmatpush.msra.mxu2 %v543_v52  ;;  %1431 = vmatpush.msra.mxu3 %v1332_v60  ;;  %v3313_v52 = vpop.f32.mrf.mxu3  ;;  %v1343_v60 = vld [vmem:[%s3573_s6 + $0xa8] sm:$0xff] }
 0x1a5   :  { %1454 = vmatpush.msra.mxu0 %v1345_v53  ;;  %v1409_v53 = vld [vmem:[%s3573_s6 + $0x2b8] sm:$0xff] }
 0x1a6   :  { %1239 = vmatpush.msra.mxu2 %v528_v56  ;;  %1432 = vmatpush.msra.mxu3 %v1331_v63  ;;  %v1392_v56 = vld [vmem:[%s3573_s6 + $0x230] sm:$0xff]  ;;  %v1389_v63 = vld [vmem:[%s3573_s6 + $0x218] sm:$0xff] }
 0x1a7   :  { %v3229_v24 = vpop.f32.mrf.mxu2  ;;  %1455 = vmatpush.msra.mxu0 %v1344_v57 }
 0x1a8   :  { %1240 = vmatpush.msra.mxu2 %v513_v59  ;;  %1433 = vmatpush.msra.mxu3 %v1330_v1 }
 0x1a9   :  { %1456 = vmatpush.msra.mxu0 %v1343_v60  ;;  %v1356_v60 = vld [vmem:[%s3573_s6 + $0x110] sm:$0xff] }
 0x1aa   :  { %1241 = vmatpush.msra.mxu2 %v498_v62  ;;  %1434 = vmatpush.msra.mxu3 %v1329_v3  ;;  %v1342_v62 = vld [vmem:[%s3573_s6 + $0xa0] sm:$0xff]  ;;  %v1388_v3 = vld [vmem:[%s3573_s6 + $0x210] sm:$0xff] }
 0x1ab   :  { %v3259_v34 = vpop.f32.mrf.mxu0  ;;  %1457 = vmatpush.msra.mxu0 %v1342_v62  ;;  %v1355_v62 = vld [vmem:[%s3573_s6 + $0x108] sm:$0xff] }
 0x1ac   :  { %1242 = vmatpush.msra.mxu2 %v483_v0  ;;  %1435 = vmatpush.msra.mxu3 %v1328_v6  ;;  %v1341_v0 = vld [vmem:[%s3573_s6 + $0x98] sm:$0xff]  ;;  %v3347_v1 = vpop.f32.mrf.mxu3  ;;  %v1340_v6 = vld [vmem:[%s3573_s6 + $0x90] sm:$0xff] }
 0x1ad   :  { %1458 = vmatpush.msra.mxu0 %v1341_v0  ;;  %v1405_v0 = vld [vmem:[%s3573_s6 + $0x298] sm:$0xff] }
 0x1ae   :  { %1243 = vmatpush.msra.mxu2 %v468_v2  ;;  %1436 = vmatpush.msra.mxu3 %v1327_v8  ;;  %v1339_v8 = vld [vmem:[%s3573_s6 + $0x88] sm:$0xff] }
 0x1af   :  { %1459 = vmatpush.msra.mxu0 %v1340_v6  ;;  %v1421_v6 = vld [vmem:[%s3573_s6 + $0x318] sm:$0xff] }
 0x1b0   :  { %1244 = vmatpush.msra.mxu2 %v453_v5  ;;  %1437 = vmatpush.msra.mxu3 %v1326_v12  ;;  %v3282_v41 = vpop.f32.mrf.mxu2  ;;  %v3352_v5 = vpop.f32.mrf.mxu1 }
 0x1b1   :  { %1460 = vmatpush.msra.mxu0 %v1339_v8 }
 0x1b2   :  { %1245 = vmatpush.msra.mxu2 %v438_v7  ;;  %1438 = vmatpush.msra.mxu3 %v1325_v15  ;;  %v1387_v7 = vld [vmem:[%s3573_s6 + $0x208] sm:$0xff] }
 0x1b4   :  { %1246 = vmatpush.msra.mxu2 %v423_v11  ;;  %1439 = vmatpush.msra.mxu3 %v1324_v17  ;;  %v1338_v11 = vld [vmem:[%s3573_s6 + $0x80] sm:$0xff] }
 0x1b5   :  { %v3302_v49 = vpop.f32.mrf.mxu0  ;;  %1461 = vmatpush.msra.mxu0 %v1338_v11 }
 0x1b6   :  { %1247 = vmatpush.msra.mxu2 %v408_v14  ;;  %1440 = vmatpush.msra.mxu3 %v1323_v23  ;;  %v1368_v14 = vld [vmem:[%s3573_s6 + $0x170] sm:$0xff]  ;;  %v1417_v23 = vld [vmem:[%s3573_s6 + $0x2f8] sm:$0xff] }
 0x1b7   :  { %1526 = vmatpush.msrb.mxu0 %v1417_v23 }
 0x1b8   :  { %1248 = vmatpush.msra.mxu2 %v393_v16  ;;  %1441 = vmatpush.msra.mxu3 %v1322_v26  ;;  %v1367_v16 = vld [vmem:[%s3573_s6 + $0x168] sm:$0xff]  ;;  %v3382_v18 = vpop.f32.mrf.mxu1  ;;  %v1364_v26 = vld [vmem:[%s3573_s6 + $0x150] sm:$0xff] }
 0x1ba   :  { %1249 = vmatpush.msra.mxu2 %v378_v22  ;;  %1506 = vmatpush.msrb.mxu3 %v1401_v27  ;;  %v3321_v55 = vpop.f32.mrf.mxu2  ;;  %v1365_v22 = vld [vmem:[%s3573_s6 + $0x158] sm:$0xff]  ;;  %v1416_v27 = vld [vmem:[%s3573_s6 + $0x2f0] sm:$0xff] }
 0x1bb   :  { %1527 = vmatpush.msrb.mxu0 %v1416_v27  ;;  %v833_v8 = vadd.f32 %v3321_v55, %v3352_v5  ;;  %v1418_v5 = vld [vmem:[%s3573_s6 + $0x300] sm:$0xff] }
 0x1bc   :  { %1250 = vmatpush.msra.mxu2 %v363_v25  ;;  %1507 = vmatpush.msrb.mxu3 %v1400_v32  ;;  %v1363_v32 = vld [vmem:[%s3573_s6 + $0x148] sm:$0xff] }
 0x1bd   :  { %1251 = vmatmul.f32.vlgmr.msra.gmra.mxu2 %v2436_v21  ;;  %v1375_v21 = vld [vmem:[%s3573_s6 + $0x1a8] sm:$0xff]  ;;  %1528 = vmatpush.msrb.mxu0 %v1415_v29 }
 0x1be   :  { %1508 = vmatpush.msrb.mxu3 %v1399_v33  ;;  %1496 = vmatpush.msra.mxu1 %v1375_v21  ;;  %v1414_v33 = vld [vmem:[%s3573_s6 + $0x2e0] sm:$0xff] }
 0x1bf   :  { %1466 = vmatpush.msrb.mxu2 %v1369_v13  ;;  %v1362_v21 = vld [vmem:[%s3573_s6 + $0x140] sm:$0xff]  ;;  %1529 = vmatpush.msrb.mxu0 %v1414_v33 }
 0x1c0   :  { %1509 = vmatpush.msrb.mxu3 %v1398_v35  ;;  %1497 = vmatpush.msra.mxu1 %v1374_v38  ;;  %v1052_v35 = vpop.f32.mrf.mxu1  ;;  %v1361_v38 = vld [vmem:[%s3573_s6 + $0x138] sm:$0xff] }
 0x1c1   :  { %v1012_v12 = vpop.f32.mrf.mxu3  ;;  %1467 = vmatpush.msrb.mxu2 %v1368_v14 }
 0x1c2   :  { %1510 = vmatpush.msrb.mxu3 %v1397_v39  ;;  %1498 = vmatpush.msra.mxu1 %v1373_v43  ;;  %v753_v39 = vadd.f32 %v3229_v24, %v3174_v4  ;;  %v1412_v43 = vld [vmem:[%s3573_s6 + $0x2d0] sm:$0xff]  ;;  %v1359_v4 = vld [vmem:[%s3573_s6 + $0x128] sm:$0xff] }
 0x1c3   :  { %1468 = vmatpush.msrb.mxu2 %v1367_v16  ;;  %v1411_v24 = vld [vmem:[%s3573_s6 + $0x2c8] sm:$0xff] }
 0x1c4   :  { %1511 = vmatpush.msrb.mxu3 %v1396_v44  ;;  %1499 = vmatpush.msra.mxu1 %v1372_v47  ;;  %v1360_v44 = vld [vmem:[%s3573_s6 + $0x130] sm:$0xff] }
 0x1c5   :  { %1469 = vmatpush.msrb.mxu2 %v1366_v19  ;;  %v1419_v19 = vld [vmem:[%s3573_s6 + $0x308] sm:$0xff] }
 0x1c6   :  { %1512 = vmatpush.msrb.mxu3 %v1395_v45  ;;  %1500 = vmatpush.msra.mxu1 %v1371_v51  ;;  %v1410_v51 = vld [vmem:[%s3573_s6 + $0x2c0] sm:$0xff] }
 0x1c7   :  { %1470 = vmatpush.msrb.mxu2 %v1365_v22 }
 0x1c8   :  { %1513 = vmatpush.msrb.mxu3 %v1394_v48  ;;  %1501 = vmatpush.msra.mxu1 %v1370_v54  ;;  %v1358_v48 = vld [vmem:[%s3573_s6 + $0x120] sm:$0xff]  ;;  %v913_v54 = vadd.f32 %v3259_v34, %v3347_v1  ;;  %v1408_v34 = vld [vmem:[%s3573_s6 + $0x2b0] sm:$0xff] }
 0x1c9   :  { %1471 = vmatpush.msrb.mxu2 %v1364_v26  ;;  %v1404_v1 = vld [vmem:[%s3573_s6 + $0x290] sm:$0xff] }
 0x1ca   :  { %1514 = vmatpush.msrb.mxu3 %v1393_v42  ;;  %v1357_v42 = vld [vmem:[%s3573_s6 + $0x118] sm:$0xff] }
 0x1cb   :  { %1472 = vmatpush.msrb.mxu2 %v1363_v32 }
 0x1cc   :  { %1515 = vmatpush.msrb.mxu3 %v1392_v56 }
 0x1cd   :  { %1473 = vmatpush.msrb.mxu2 %v1362_v21 }
 0x1ce   :  { %1516 = vmatpush.msrb.mxu3 %v1391_v58  ;;  %v793_v58 = vadd.f32 %v3282_v41, %v3313_v52  ;;  %v1407_v41 = vld [vmem:[%s3573_s6 + $0x2a8] sm:$0xff]  ;;  %v1354_v52 = vld [vmem:[%s3573_s6 + $0x100] sm:$0xff] }
 0x1cf   :  { %v972_v59 = vpop.f32.mrf.mxu0  ;;  %1474 = vmatpush.msrb.mxu2 %v1361_v38  ;;  %v1584_v38 = vld [vmem:[%s3574_s7 + $0x8] sm:$0xff] }
 0x1d0   :  { %1517 = vmatpush.msrb.mxu3 %v1390_v61 }
 0x1d1   :  { %1475 = vmatpush.msrb.mxu2 %v1360_v44  ;;  %v1627_v44 = vld [vmem:[%s3575_s8 + $0x50] sm:$0xff] }
 0x1d2   :  { %1518 = vmatpush.msrb.mxu3 %v1389_v63  ;;  %v1406_v63 = vld [vmem:[%s3573_s6 + $0x2a0] sm:$0xff] }
 0x1d3   :  { %1476 = vmatpush.msrb.mxu2 %v1359_v4  ;;  %v1623_v4 = vld [vmem:[%s3575_s8 + $0x30] sm:$0xff] }
 0x1d4   :  { %v852_v2 = vpop.f32.mrf.mxu2  ;;  %1519 = vmatpush.msrb.mxu3 %v1388_v3  ;;  %v1402_v3 = vld [vmem:[%s3573_s6 + $0x280] sm:$0xff] }
 0x1d5   :  { %v873_v30 = vadd.f32 %v3221_v20, %v852_v2  ;;  %v1413_v20 = vld [vmem:[%s3573_s6 + $0x2d8] sm:$0xff]  ;;  %1477 = vmatpush.msrb.mxu2 %v1358_v48  ;;  %v1403_v2 = vld [vmem:[%s3573_s6 + $0x288] sm:$0xff] }
 0x1d6   :  { %1520 = vmatpush.msrb.mxu3 %v1387_v7  ;;  %1530 = vmatpush.msrb.mxu0 %v1413_v20 }
 0x1d7   :  { %1478 = vmatpush.msrb.mxu2 %v1357_v42 }
 0x1d8   :  { %1521 = vmatpush.msrb.mxu3 %v1386_v9  ;;  %1531 = vmatpush.msrb.mxu0 %v1412_v43  ;;  %v1628_v43 = vld [vmem:[%s3575_s8 + $0x58] sm:$0xff] }
 0x1d9   :  { %1479 = vmatpush.msrb.mxu2 %v1356_v60  ;;  %v1619_v60 = vld [vmem:[%s3575_s8 + $0x10] sm:$0xff] }
 0x1da   :  { %v3366_v10 = vpop.f32.mrf.mxu0  ;;  %1532 = vmatpush.msrb.mxu0 %v1411_v24 }
 0x1db   :  { %1480 = vmatpush.msrb.mxu2 %v1355_v62 }
 0x1dc   :  { %1533 = vmatpush.msrb.mxu0 %v1410_v51 }
 0x1dd   :  { %1481 = vmatpush.msrb.mxu2 %v1354_v52 }
 0x1de   :  { %1534 = vmatpush.msrb.mxu0 %v1409_v53 }
 0x1df   :  { %v992_v15 = vpop.f32.mrf.mxu2  ;;  %1558 = vmatpush.msra.mxu2 %v1421_v6 }
 0x1e0   :  { %v3380_v17 = vadd.f32 %v992_v15, %v972_v59  ;;  %v1172_v46 = vpop.f32.mrf.mxu1  ;;  %1535 = vmatpush.msrb.mxu0 %v1408_v34  ;;  %v953_v15 = vadd.f32 %v3302_v49, %v3382_v18  ;;  %v1618_v34 = vld [vmem:[%s3575_s8 + $0x8] sm:$0xff] }
 0x1e2   :  { %1536 = vmatpush.msrb.mxu0 %v1407_v41 }
 0x1e4   :  { %1537 = vmatpush.msrb.mxu0 %v1406_v63 }
 0x1e5   :  { %v1132_v25 = vpop.f32.mrf.mxu3 }
 0x1e6   :  { %v1152_v28 = vpop.f32.mrf.mxu0  ;;  %1538 = vmatpush.msrb.mxu0 %v1405_v0 }
 0x1e7   :  { %v1153_v31 = vadd.f32 %v1152_v28, %v1132_v25 }
 0x1e8   :  { %1539 = vmatpush.msrb.mxu0 %v1404_v1 }
 0x1e9   :  { %v1318_v36 = vmul.f32 %v1153_v31, %v873_v30 }
 0x1ea   :  { %1540 = vmatpush.msrb.mxu0 %v1403_v2  ;;  %v15_v2 = vstv %s3576_s9 }
 0x1eb   :  { %v1032_v37 = vpop.f32.mrf.mxu2  ;;  %1502 = vmatmul.f32.vlgmr.msra.gmra.mxu1 %v1318_v36  ;;  %16 = vst [vmem:[#allocation2] sm:$0x1] %v15_v2 }
 0x1ec   :  { %v1033_v40 = vadd.f32 %v1032_v37, %v1012_v12  ;;  %1541 = vmatpush.msrb.mxu0 %v1402_v3  ;;  %v1420_v12 = vld [vmem:[%s3573_s6 + $0x310] sm:$0xff]  ;;  %s1787_s6 = smov 68   ;;  %v1791_v3 = vmov 0  }
 0x1ed   :  { %1559 = vmatpush.msra.mxu2 %v1420_v12  ;;  %1781 = vset.pattern.permute.xlu2 %v1791_v3 }
 0x1ee   :  { %v1315_v45 = vmul.f32 %v1033_v40, %v753_v39  ;;  %v1583_v39 = vld [vmem:[%s3574_s7] sm:$0xff]  ;;  %1782 = vset.pattern.permute.xlu0 %v1791_v3 }
 0x1ef   :  { %1560 = vmatpush.msra.mxu2 %v1419_v19  ;;  %v1629_v40 = vld [vmem:[%s3575_s8 + $0x60] sm:$0xf] }
 0x1f0   :  { %1442 = vmatmul.f32.vlgmr.msra.gmra.mxu3 %v1315_v45  ;;  %1769 = vmatpush.msk.msrb.mxu1 %vm1590_vm6, %v1629_v40  ;;  %v1626_v45 = vld [vmem:[%s3575_s8 + $0x48] sm:$0xff] }
 0x1f1   :  { %v1192_v47 = vpop.f32.mrf.mxu0  ;;  %1561 = vmatpush.msra.mxu2 %v1418_v5 }
 0x1f2   :  { %v1193_v50 = vadd.f32 %v1192_v47, %v1172_v46  ;;  %1641 = vmatpush.msrb.mxu1 %v1628_v43  ;;  %v1625_v46 = vld [vmem:[%s3575_s8 + $0x40] sm:$0xff]  ;;  %v1624_v47 = vld [vmem:[%s3575_s8 + $0x38] sm:$0xff] }
 0x1f4   :  { %v1319_v56 = vmul.f32 %v1193_v50, %v913_v54  ;;  %1642 = vmatpush.msrb.mxu1 %v1627_v44 }
 0x1f6   :  { %v1072_v57 = vpop.f32.mrf.mxu2  ;;  %1643 = vmatpush.msrb.mxu1 %v1626_v45 }
 0x1f7   :  { %v1073_v59 = vadd.f32 %v1072_v57, %v1052_v35  ;;  %v1622_v57 = vld [vmem:[%s3575_s8 + $0x28] sm:$0xff] }
 0x1f8   :  { %1522 = vmatmul.f32.vlgmr.msrb.gmra.mxu3 %v1319_v56  ;;  %1644 = vmatpush.msrb.mxu1 %v1625_v46 }
 0x1f9   :  { %v1316_v61 = vmul.f32 %v1073_v59, %v793_v58  ;;  %v1621_v58 = vld [vmem:[%s3575_s8 + $0x20] sm:$0xff]  ;;  %v1620_v59 = vld [vmem:[%s3575_s8 + $0x18] sm:$0xff] }
 0x1fa   :  { %1645 = vmatpush.msrb.mxu1 %v1624_v47 }
 0x1fb   :  { %1462 = vmatmul.f32.vlgmr.msra.gmra.mxu0 %v1316_v61  ;;  %v1617_v61 = vld [vmem:[%s3575_s8] sm:$0xff] }
 0x1fc   :  { %1646 = vmatpush.msrb.mxu1 %v1623_v4 }
 0x1fe   :  { %1647 = vmatpush.msrb.mxu1 %v1622_v57 }
 0x200   :  { %1648 = vmatpush.msrb.mxu1 %v1621_v58 }
 0x202   :  { %1649 = vmatpush.msrb.mxu1 %v1620_v59 }
 0x203   :  { %v3498_v18 = vpop.f32.mrf.mxu1 }
 0x204   :  { %1650 = vmatpush.msrb.mxu1 %v1619_v60 }
 0x206   :  { %1651 = vmatpush.msrb.mxu1 %v1618_v34 }
 0x208   :  { %1652 = vmatpush.msrb.mxu1 %v1617_v61 }
 0x211   :  { %v1212_v13 = vpop.f32.mrf.mxu0 }
 0x216   :  { %v1092_v7 = vpop.f32.mrf.mxu2 }
 0x217   :  { %v1113_v9 = vadd.f32 %v3366_v10, %v1092_v7  ;;  %v1272_v10 = vpop.f32.mrf.mxu3  ;;  %v1689_v7 = vld [vmem:[#allocation2] sm:$0x1] }
 0x218   :  { %1692 = vperm.xlu2 %1781, %v1689_v7  }
 0x219   :  { %v1317_v11 = vmul.f32 %v1113_v9, %v833_v8 }
 0x21b   :  { %1482 = vmatmul.f32.vlgmr.msrb.gmra.mxu2 %v1317_v11 }
 0x21f   :  { %v3496_v49 = vpop.f32.mrf.mxu3 }
 0x220   :  { %v1232_v14 = vpop.f32.mrf.mxu2  ;;  %v1313_v63 = vadd.f32 %v3496_v49, %v3498_v18 }
 0x221   :  { %v1233_v16 = vadd.f32 %v1232_v14, %v1212_v13 }
 0x223   :  { %v1320_v55 = vmul.f32 %v1233_v16, %v953_v15 }
 0x225   :  { %1542 = vmatmul.f32.vlgmr.msrb.gmra.mxu0 %v1320_v55  ;;  %v1792_v55 = vmov 0.2  }
 0x240   :  { %v1252_v22 = vpop.f32.mrf.mxu2 }
 0x241   :  { %v1273_v23 = vadd.f32 %v1272_v10, %v1252_v22 }
 0x243   :  { %v1321_v25 = vmul.f32 %v1273_v23, %v3380_v17  ;;  %v1585_v17 = vld [vmem:[%s3574_s7 + $0x10] sm:$0xf] }
 0x244   :  { %1767 = vmatpush.msk.msrb.mxu2 %vm1590_vm6, %v1585_v17 }
 0x245   :  { %1766 = vmatmul.msk.f32.vlgmr.msra.gmra.mxu2 %vm1422_vm5, %v1321_v25 }
 0x246   :  { %1608 = vmatpush.msrb.mxu2 %v1584_v38 }
 0x248   :  { %1609 = vmatpush.msrb.mxu2 %v1583_v39 }
 0x24a   :  { %1771 = vmatpush.msk.msra.mxu2 %vm1590_vm6, %v1629_v40 }
 0x24c   :  { %1665 = vmatpush.msra.mxu2 %v1628_v43 }
 0x24e   :  { %1666 = vmatpush.msra.mxu2 %v1627_v44 }
 0x250   :  { %1667 = vmatpush.msra.mxu2 %v1626_v45 }
 0x252   :  { %1668 = vmatpush.msra.mxu2 %v1625_v46 }
 0x254   :  { %1669 = vmatpush.msra.mxu2 %v1624_v47 }
 0x256   :  { %1670 = vmatpush.msra.mxu2 %v1623_v4 }
 0x258   :  { %1671 = vmatpush.msra.mxu2 %v1622_v57 }
 0x25a   :  { %1672 = vmatpush.msra.mxu2 %v1621_v58 }
 0x25c   :  { %1673 = vmatpush.msra.mxu2 %v1620_v59 }
 0x25e   :  { %1674 = vmatpush.msra.mxu2 %v1619_v60 }
 0x260   :  { %1675 = vmatpush.msra.mxu2 %v1618_v34 }
 0x262   :  { %1676 = vmatpush.msra.mxu2 %v1617_v61 }
 0x268   :  { %v1503_v31 = vpop.f32.mrf.mxu1 }
 0x272   :  { %v1693_v5 = vpop.permute.xlu2 %1692 }
 0x273   :  { %v1443_v27 = vpop.f32.mrf.mxu3  ;;  %v1695_v10 = vperm.slane %v1693_v5, 0 }
 0x278   :  { %v1463_v26 = vpop.f32.mrf.mxu0 }
 0x279   :  { %v1464_v29 = vadd.f32 %v1463_v26, %v1443_v27 }
 0x27b   :  { %v1523_v33 = vpop.f32.mrf.mxu3 }
 0x29e   :  { %v1483_v28 = vpop.f32.mrf.mxu2 }
 0x29f   :  { %v1484_v30 = vadd.f32 %v1483_v28, %v1464_v29 }
 0x2a1   :  { %v1504_v32 = vadd.f32 %v1503_v31, %v1484_v30 }
 0x2a2   :  { %v1543_v36 = vpop.f32.mrf.mxu0 }
 0x2a3   :  { %v1524_v35 = vadd.f32 %v1523_v33, %v1504_v32 }
 0x2a5   :  { %v1544_v21 = vadd.f32 %v1543_v36, %v1524_v35 }
 0x2c8   :  { %v1563_v20 = vpop.f32.mrf.mxu2 }
 0x2c9   :  { %v3500_v37 = vadd.f32 %v1563_v20, %v1544_v21 }
 0x2cb   :  { %1575 = vrot.lane.b32.xlu1 %v3500_v37, %s1787_s6  ;;  %1567 = vrot.lane.b32.xlu0 %v3500_v37, %s1788_s19 }
 0x2d3   :  { %1579 = vrot.lane.b32.xlu1 %v3500_v37, %s1789_s1  ;;  %1571 = vrot.lane.b32.xlu0 %v3500_v37, %s1790_s20 }
 0x33d   :  { %v1568_v24 = vpop.permute.xlu0 %1567  ;;  %v1576_v48 = vpop.permute.xlu1 %1575 }
 0x33e   :  { %v1570_v50 = vmax.f32 %v3500_v37, %v1568_v24 }
 0x345   :  { %v1572_v51 = vpop.permute.xlu0 %1571  ;;  %v1580_v54 = vpop.permute.xlu1 %1579 }
 0x346   :  { %v1574_v42 = vmax.f32 %v1570_v50, %v1572_v51 }
 0x348   :  { %v1578_v53 = vmax.f32 %v1574_v42, %v1576_v48 }
 0x34a   :  { %v1582_v56 = vmax.f32 %v1578_v53, %v1580_v54 }
 0x34c   :  { %1768 = vmatmul.msk.f32.vlgmr.msrb.gmra.mxu2 %vm1586_vm7, %v1582_v56 }
 0x3cf   :  { %v1611_v62 = vpop.f32.mrf.mxu2 }
 0x3d0   :  { %v1614_v41 = vsub.f32 %v3500_v37, %v1611_v62 }
 0x3d2   :  { %v1615_v52 = vmul.f32 1.442695, %v1614_v41 }
 0x3d4   :  { %1783 = vpow2.f32 %v1615_v52 }
 0x3da   :  { %v1784_v0 = vpop.eup %1783 }
 0x3db   :  { %v1657_v1 = vmul.f32 %v1784_v0, %v1313_v63  ;;  %1770 = vmatmul.msk.f32.vlgmr.msrb.gmra.mxu1 %vm1630_vm8, %v1784_v0 }
 0x3dd   :  { %1772 = vmatmul.msk.f32.vlgmr.msra.gmra.mxu2 %vm1630_vm8, %v1657_v1 }
 0x458   :  { %v1654_v6 = vpop.f32.mrf.mxu1 }
 0x459   :  { %1785 = vrcp.f32 %v1654_v6 }
 0x45f   :  { %v1786_v8 = vpop.eup %1785 }
 0x460   :  { %v1682_v9 = vmul.f32 %v1786_v8, %v1654_v6  ;;  %v1678_v16 = vpop.f32.mrf.mxu2 }
 0x462   :  { %v1683_v11 = vsub.f32 2.0, %v1682_v9 }
 0x464   :  { %v1684_v12 = vmul.f32 %v1786_v8, %v1683_v11 }
 0x466   :  { %v1685_v13 = vmul.f32 %v1684_v12, %v1654_v6 }
 0x468   :  { %v1686_v14 = vsub.f32 2.0, %v1685_v13 }
 0x46a   :  { %v1687_v15 = vmul.f32 %v1686_v14, %v1684_v12 }
 0x46c   :  { %v1688_v19 = vmul.f32 %v1687_v15, %v1678_v16 }
 0x46e   :  { %1773 = vmatpush.xpose.msk.msra.mxu3 %vm1586_vm7, %v1688_v19 }
 0x471   :  { %1774 = vmatmul.msk.f32.vlgmr.msra.gmra.mxu3 %vm1586_vm7, %v1792_v55 }
 0x4f4   :  { %v1719_v22 = vpop.f32.mrf.mxu3 }
 0x4f5   :  { %v1720_v23 = vadd.f32 %v1719_v22, %v1695_v10 }
 0x4f7   :  { %1723 = vst.msk [vmem:[%s3577_s10] sm:$0x1] %vm1722_vm9, %v1720_v23 }

</bundles_post_ra>
